<compile_context>
chip_gen: v7x
topology: tpu7x:2x2x1
jax: 0.10.0
libtpu: 0.0.40
codegen_flags: <defaults>
</compile_context>

<pallas_src>
import functools

import jax
import jax.numpy as jnp
from jax import lax
from jax.experimental import pallas as pl
from jax.experimental.pallas import tpu as pltpu

EPS = 1e-5
NEG_SLOPE = 0.1


def _conv_stats_kernel(x_ref, w_ref, y_ref, stats_ref, *, kk, th, ww, cpad):
    """Phase 1: conv for one (TH x W) row-tile of one image + BN partial statistics.

    x_ref:     (Hp, Wp, Cin)    f32  -- whole padded image, reused across the H-tile axis
    w_ref:     (K*K, Cin, Cpad) bf16 -- resident (constant index_map)
    y_ref:     (TH*W, Cpad)     f32  -- conv output tile (lane-dense)
    stats_ref: (2, Cpad)        f32  -- per-tile [sum, sum_of_squares] over rows
    """
    t = pl.program_id(1)
    r0 = t * th                      # first padded input row needed by this output tile
    cin = x_ref.shape[2]
    tm = th * ww

    acc = jnp.zeros((tm, cpad), jnp.float32)
    for dy in range(kk):             # static unroll: K*K accumulated MXU matmuls
        for dx in range(kk):
            slab = x_ref[pl.ds(r0 + dy, th), pl.ds(dx, ww), :]      # (TH, W, Cin) f32
            slab = slab.reshape(tm, cin).astype(jnp.bfloat16)       # bf16 MXU operand
            acc = acc + jnp.dot(slab, w_ref[dy * kk + dx],
                                preferred_element_type=jnp.float32)

    y_ref[...] = acc
    # Per-tile partial sums in f32; global mean/var are finalized once in the wrapper.
    stats_ref[0:1, :] = jnp.sum(acc, axis=0, keepdims=True)
    stats_ref[1:2, :] = jnp.sum(acc * acc, axis=0, keepdims=True)


def _bn_act_kernel(y_ref, scale_ref, shift_ref, o_ref):
    """Phase 2: y * scale + shift (folded BatchNorm) followed by LeakyReLU(0.1)."""
    z = y_ref[...] * scale_ref[...] + shift_ref[...]
    o_ref[...] = jnp.where(z > 0, z, NEG_SLOPE * z)


def _pick_th(h, w, max_rows):
    """Largest divisor th of h with th*w <= max_rows and th*w a multiple of 8 (sublane tile)."""
    for th in range(h, 0, -1):
        if h % th:
            continue
        rows = th * w
        if rows <= max_rows and (rows % 8 == 0 or th == h):
            return th
    return h


@functools.partial(jax.jit, static_argnames=("kernel_size", "padding", "max_tile_rows"))
def cnn_block(x_nchw, weight, gamma, beta, *, kernel_size=3, padding=1, max_tile_rows=1024):
    """x_nchw: (N, Cin, H, W); weight: (Cout, Cin, K, K) PyTorch layout; gamma/beta: (Cout,).
    Returns (N, Cout, H, W) = LeakyReLU(BatchNorm(Conv(x))) using batch statistics."""
    n, cin, h, w = x_nchw.shape
    cout = weight.shape[0]
    k = kernel_size
    assert padding == (k - 1) // 2, "stride-1 'same' convolution assumed"
    cpad = ((cout + 127) // 128) * 128        # lane-dense Cout: unmasked stores, full MXU width

    # --- XLA-side layout glue -----------------------------------------------------------------
    x_nhwc = jnp.transpose(x_nchw, (0, 2, 3, 1)).astype(jnp.float32)
    xp = jnp.pad(x_nhwc, ((0, 0), (padding, padding), (padding, padding), (0, 0)))
    hp, wp = h + 2 * padding, w + 2 * padding
    # weight (Cout, Cin, K, K) -> (K*K, Cin, Cout_pad), bf16 MXU operand.
    w_kkc = jnp.transpose(weight, (2, 3, 1, 0)).reshape(k * k, cin, cout)
    w_kkc = jnp.pad(w_kkc, ((0, 0), (0, 0), (0, cpad - cout))).astype(jnp.bfloat16)

    th = _pick_th(h, w, max_tile_rows)        # H-tile height; tm = th*w rows per grid step
    n_th = h // th
    tm = th * w

    # --- Phase 1: conv (K*K accumulated MXU matmuls) + per-tile BN partial sums ----------------
    conv_kernel = functools.partial(_conv_stats_kernel, kk=k, th=th, ww=w, cpad=cpad)
    y, stats = pl.pallas_call(
        conv_kernel,
        out_shape=(
            jax.ShapeDtypeStruct((n, h * w, cpad), jnp.float32),
            jax.ShapeDtypeStruct((n, n_th, 2, cpad), jnp.float32),
        ),
        grid=(n, n_th),
        in_specs=[
            # Whole padded image per batch element; index ignores t => DMA'd once, reused per tile.
            # TODO(synk): switch to manual halo-DMA H-tiling if Hp*Wp*Cin outgrows v7x's 64 MiB VMEM.
            pl.BlockSpec((None, hp, wp, cin), lambda i, t: (i, 0, 0, 0)),
            pl.BlockSpec((k * k, cin, cpad), lambda i, t: (0, 0, 0)),   # resident weights
        ],
        out_specs=(
            pl.BlockSpec((None, tm, cpad), lambda i, t: (i, t, 0)),
            pl.BlockSpec((None, None, 2, cpad), lambda i, t: (i, t, 0, 0)),
        ),
        compiler_params=pltpu.CompilerParams(
            dimension_semantics=("parallel", "arbitrary")),
    )(xp, w_kkc)

    # --- Finalize global batch statistics once (Cout-sized, negligible) ------------------------
    # TODO(synk): PyTorch BatchNorm2d also updates running_mean/running_var in training; only the
    # normalization forward (biased batch variance) is implemented here.
    tot = jnp.sum(stats, axis=(0, 1))                       # (2, Cpad), f32 accumulators
    count = jnp.float32(n * h * w)
    mean = tot[0] / count
    var = jnp.maximum(tot[1] / count - mean * mean, 0.0)
    inv_std = lax.rsqrt(var + EPS)
    g = jnp.pad(gamma.astype(jnp.float32), (0, cpad - cout))
    b = jnp.pad(beta.astype(jnp.float32), (0, cpad - cout))
    scale = (g * inv_std).reshape(1, cpad)
    shift = (b - mean * g * inv_std).reshape(1, cpad)

    # --- Phase 2: folded BN + LeakyReLU over lane-dense tiles -----------------------------------
    out_flat = pl.pallas_call(
        _bn_act_kernel,
        out_shape=jax.ShapeDtypeStruct((n, h * w, cpad), jnp.float32),
        grid=(n, n_th),
        in_specs=[
            pl.BlockSpec((None, tm, cpad), lambda i, t: (i, t, 0)),
            pl.BlockSpec((1, cpad), lambda i, t: (0, 0)),   # resident folded scale
            pl.BlockSpec((1, cpad), lambda i, t: (0, 0)),   # resident folded shift
        ],
        out_specs=pl.BlockSpec((None, tm, cpad), lambda i, t: (i, t, 0)),
        compiler_params=pltpu.CompilerParams(
            dimension_semantics=("parallel", "arbitrary")),
    )(y, scale, shift)

    out_nhwc = out_flat.reshape(n, h, w, cpad)[..., :cout]
    return jnp.transpose(out_nhwc, (0, 3, 1, 2))            # NHWC -> NCHW


def _reference(x_nchw, weight, gamma, beta, padding=1):
    # Pure-JAX reference with the same bf16 operand rounding as the kernel path.
    xb = x_nchw.astype(jnp.bfloat16).astype(jnp.float32)
    wb = weight.astype(jnp.bfloat16).astype(jnp.float32)
    y = lax.conv_general_dilated(
        xb, wb, window_strides=(1, 1),
        padding=[(padding, padding), (padding, padding)],
        dimension_numbers=("NCHW", "OIHW", "NCHW"))
    mean = jnp.mean(y, axis=(0, 2, 3), keepdims=True)
    var = jnp.mean((y - mean) ** 2, axis=(0, 2, 3), keepdims=True)
    z = (y - mean) * lax.rsqrt(var + EPS)
    z = z * gamma.reshape(1, -1, 1, 1) + beta.reshape(1, -1, 1, 1)
    return jnp.where(z > 0, z, NEG_SLOPE * z)


if __name__ == "__main__":
    key = jax.random.PRNGKey(0)
    k_x, k_w, k_g, k_b = jax.random.split(key, 4)

    N, CIN, COUT, H, W, K = 2, 4, 8, 16, 16, 3

    x = jax.random.normal(k_x, (N, CIN, H, W), dtype=jnp.float32)
    weight = jax.random.normal(k_w, (COUT, CIN, K, K), dtype=jnp.float32) * 0.1
    gamma = 1.0 + 0.1 * jax.random.normal(k_g, (COUT,), dtype=jnp.float32)
    beta = 0.1 * jax.random.normal(k_b, (COUT,), dtype=jnp.float32)

    ref = _reference(x, weight, gamma, beta, padding=1)

    # Default path (one H-tile per image at these toy sizes).
    out = jax.block_until_ready(cnn_block(x, weight, gamma, beta, kernel_size=K, padding=1))
    assert out.shape == (N, COUT, H, W), out.shape
    assert jnp.allclose(out, ref, atol=1e-2, rtol=1e-2), float(jnp.max(jnp.abs(out - ref)))

    # Multi-tile path (2 H-tiles per image) must reproduce the same global BN statistics.
    out_tiled = jax.block_until_ready(
        cnn_block(x, weight, gamma, beta, kernel_size=K, padding=1, max_tile_rows=128))
    assert jnp.allclose(out_tiled, ref, atol=1e-2, rtol=1e-2), \
        float(jnp.max(jnp.abs(out_tiled - ref)))

    print("KERNEL_OK")
</pallas_src>

<mosaic_0001>
module attributes {stable_mosaic.version = 11 : i64} {
  func.func @_bn_act_kernel(%arg0: i32, %arg1: i32, %arg2: memref<1x256x128xf32, #tpu.memory_space<vmem>>, %arg3: memref<1x128xf32, #tpu.memory_space<vmem>>, %arg4: memref<1x128xf32, #tpu.memory_space<vmem>>, %arg5: memref<1x256x128xf32, #tpu.memory_space<vmem>>) attributes {dimension_semantics = [#tpu.dimension_semantics<parallel>, #tpu.dimension_semantics<arbitrary>], iteration_bounds = array<i64: 2, 1>, scalar_prefetch = 0 : i64, scratch_operands = 0 : i64, tpu.core_type = #tpu.core_type<tc>, window_params = [{transform_indices = @transform_0, window_bounds = array<i64: 1, 256, 128>}, {pipeline_mode = #tpu.pipeline_mode<synchronous>, transform_indices = @transform_1, window_bounds = array<i64: 1, 128>}, {pipeline_mode = #tpu.pipeline_mode<synchronous>, transform_indices = @transform_2, window_bounds = array<i64: 1, 128>}, {transform_indices = @transform_3, window_bounds = array<i64: 1, 256, 128>}]} {
    %c0 = arith.constant 0 : index
    %c0_0 = arith.constant 0 : index
    %c0_1 = arith.constant 0 : index
    %0 = vector.load %arg2[%c0, %c0_0, %c0_1] : memref<1x256x128xf32, #tpu.memory_space<vmem>>, vector<1x256x128xf32>
    %1 = vector.shape_cast %0 : vector<1x256x128xf32> to vector<256x128xf32>
    %c0_2 = arith.constant 0 : index
    %c0_3 = arith.constant 0 : index
    %2 = vector.load %arg3[%c0_2, %c0_3] : memref<1x128xf32, #tpu.memory_space<vmem>>, vector<1x128xf32>
    %3 = vector.broadcast %2 : vector<1x128xf32> to vector<256x128xf32>
    %4 = arith.mulf %1, %3 : vector<256x128xf32>
    %c0_4 = arith.constant 0 : index
    %c0_5 = arith.constant 0 : index
    %5 = vector.load %arg4[%c0_4, %c0_5] : memref<1x128xf32, #tpu.memory_space<vmem>>, vector<1x128xf32>
    %6 = vector.broadcast %5 : vector<1x128xf32> to vector<256x128xf32>
    %7 = arith.addf %4, %6 : vector<256x128xf32>
    %cst = arith.constant 0.000000e+00 : f32
    %8 = vector.broadcast %cst : f32 to vector<256x128xf32>
    %9 = arith.cmpf ogt, %7, %8 : vector<256x128xf32>
    %cst_6 = arith.constant 1.000000e-01 : f32
    %10 = vector.broadcast %cst_6 : f32 to vector<256x128xf32>
    %11 = arith.mulf %10, %7 : vector<256x128xf32>
    %12 = arith.select %9, %7, %11 : vector<256x128xi1>, vector<256x128xf32>
    %c0_7 = arith.constant 0 : index
    %c0_8 = arith.constant 0 : index
    %c0_9 = arith.constant 0 : index
    %13 = vector.load %arg5[%c0_7, %c0_8, %c0_9] : memref<1x256x128xf32, #tpu.memory_space<vmem>>, vector<1x256x128xf32>
    %14 = vector.shape_cast %13 : vector<1x256x128xf32> to vector<256x128xf32>
    %15 = vector.shape_cast %12 : vector<256x128xf32> to vector<1x256x128xf32>
    tpu.vector_store %arg5[%c0_7, %c0_8, %c0_9], %15 {strides = array<i32>} : memref<1x256x128xf32, #tpu.memory_space<vmem>>, vector<1x256x128xf32>,
    return
  }
  func.func @transform_0(%arg0: i32, %arg1: i32) -> (i32, i32, i32) {
    %c0_i32 = arith.constant 0 : i32
    %c0_i32_0 = arith.constant 0 : i32
    return %arg0, %arg1, %c0_i32 : i32, i32, i32
  }
  func.func @transform_1(%arg0: i32, %arg1: i32) -> (i32, i32) {
    %c0_i32 = arith.constant 0 : i32
    %c0_i32_0 = arith.constant 0 : i32
    %c0_i32_1 = arith.constant 0 : i32
    return %c0_i32, %c0_i32_0 : i32, i32
  }
  func.func @transform_2(%arg0: i32, %arg1: i32) -> (i32, i32) {
    %c0_i32 = arith.constant 0 : i32
    %c0_i32_0 = arith.constant 0 : i32
    %c0_i32_1 = arith.constant 0 : i32
    return %c0_i32, %c0_i32_0 : i32, i32
  }
  func.func @transform_3(%arg0: i32, %arg1: i32) -> (i32, i32, i32) {
    %c0_i32 = arith.constant 0 : i32
    %c0_i32_0 = arith.constant 0 : i32
    return %arg0, %arg1, %c0_i32 : i32, i32, i32
  }
}

module attributes {stable_mosaic.version = 11 : i64} {
  func.func @_conv_stats_kernel(%arg0: i32, %arg1: i32, %arg2: memref<1x18x18x4xf32, #tpu.memory_space<vmem>>, %arg3: memref<9x4x128xbf16, #tpu.memory_space<vmem>>, %arg4: memref<1x256x128xf32, #tpu.memory_space<vmem>>, %arg5: memref<1x1x2x128xf32, #tpu.memory_space<vmem>>) attributes {dimension_semantics = [#tpu.dimension_semantics<parallel>, #tpu.dimension_semantics<arbitrary>], iteration_bounds = array<i64: 2, 1>, scalar_prefetch = 0 : i64, scratch_operands = 0 : i64, tpu.core_type = #tpu.core_type<tc>, window_params = [{transform_indices = @transform_0, window_bounds = array<i64: 1, 18, 18, 4>}, {pipeline_mode = #tpu.pipeline_mode<synchronous>, transform_indices = @transform_1, window_bounds = array<i64: 9, 4, 128>}, {transform_indices = @transform_2, window_bounds = array<i64: 1, 256, 128>}, {transform_indices = @transform_3, window_bounds = array<i64: 1, 1, 2, 128>}]} {
    %c16_i32 = arith.constant 16 : i32
    %0 = arith.muli %arg1, %c16_i32 : i32
    %cst = arith.constant 0.000000e+00 : f32
    %1 = vector.broadcast %cst : f32 to vector<256x128xf32>
    %c0_i32 = arith.constant 0 : i32
    %2 = arith.addi %0, %c0_i32 : i32
    %c0 = arith.constant 0 : index
    %3 = arith.index_cast %2 : i32 to index
    %c0_0 = arith.constant 0 : index
    %c0_1 = arith.constant 0 : index
    %4 = vector.load %arg2[%c0, %3, %c0_0, %c0_1] : memref<1x18x18x4xf32, #tpu.memory_space<vmem>>, vector<1x16x16x4xf32>
    %5 = vector.shape_cast %4 : vector<1x16x16x4xf32> to vector<16x16x4xf32>
    %6 = vector.shape_cast %5 : vector<16x16x4xf32> to vector<256x4xf32>
    %7 = arith.truncf %6 : vector<256x4xf32> to vector<256x4xbf16>
    %c0_2 = arith.constant 0 : index
    %c0_3 = arith.constant 0 : index
    %c0_4 = arith.constant 0 : index
    %8 = vector.load %arg3[%c0_2, %c0_3, %c0_4] : memref<9x4x128xbf16, #tpu.memory_space<vmem>>, vector<1x4x128xbf16>
    %9 = vector.shape_cast %8 : vector<1x4x128xbf16> to vector<4x128xbf16>
    %cst_5 = arith.constant dense<0.000000e+00> : vector<256x128xf32>
    %10 = tpu.matmul %7, %9, %cst_5 {dimension_numbers = #tpu.dot_dimension_numbers<[1], [0], [0], [1], [0, 0, 1, 1], [], []>} : vector<256x4xbf16>, vector<4x128xbf16>, vector<256x128xf32> -> vector<256x128xf32>
    %11 = arith.addf %1, %10 : vector<256x128xf32>
    %c0_i32_6 = arith.constant 0 : i32
    %12 = arith.addi %0, %c0_i32_6 : i32
    %c0_7 = arith.constant 0 : index
    %13 = arith.index_cast %12 : i32 to index
    %c1 = arith.constant 1 : index
    %c0_8 = arith.constant 0 : index
    %14 = vector.load %arg2[%c0_7, %13, %c1, %c0_8] : memref<1x18x18x4xf32, #tpu.memory_space<vmem>>, vector<1x16x16x4xf32>
    %15 = vector.shape_cast %14 : vector<1x16x16x4xf32> to vector<16x16x4xf32>
    %16 = vector.shape_cast %15 : vector<16x16x4xf32> to vector<256x4xf32>
    %17 = arith.truncf %16 : vector<256x4xf32> to vector<256x4xbf16>
    %c1_9 = arith.constant 1 : index
    %c0_10 = arith.constant 0 : index
    %c0_11 = arith.constant 0 : index
    %18 = vector.load %arg3[%c1_9, %c0_10, %c0_11] : memref<9x4x128xbf16, #tpu.memory_space<vmem>>, vector<1x4x128xbf16>
    %19 = vector.shape_cast %18 : vector<1x4x128xbf16> to vector<4x128xbf16>
    %cst_12 = arith.constant dense<0.000000e+00> : vector<256x128xf32>
    %20 = tpu.matmul %17, %19, %cst_12 {dimension_numbers = #tpu.dot_dimension_numbers<[1], [0], [0], [1], [0, 0, 1, 1], [], []>} : vector<256x4xbf16>, vector<4x128xbf16>, vector<256x128xf32> -> vector<256x128xf32>
    %21 = arith.addf %11, %20 : vector<256x128xf32>
    %c0_i32_13 = arith.constant 0 : i32
    %22 = arith.addi %0, %c0_i32_13 : i32
    %c0_14 = arith.constant 0 : index
    %23 = arith.index_cast %22 : i32 to index
    %c2 = arith.constant 2 : index
    %c0_15 = arith.constant 0 : index
    %24 = vector.load %arg2[%c0_14, %23, %c2, %c0_15] : memref<1x18x18x4xf32, #tpu.memory_space<vmem>>, vector<1x16x16x4xf32>
    %25 = vector.shape_cast %24 : vector<1x16x16x4xf32> to vector<16x16x4xf32>
    %26 = vector.shape_cast %25 : vector<16x16x4xf32> to vector<256x4xf32>
    %27 = arith.truncf %26 : vector<256x4xf32> to vector<256x4xbf16>
    %c2_16 = arith.constant 2 : index
    %c0_17 = arith.constant 0 : index
    %c0_18 = arith.constant 0 : index
    %28 = vector.load %arg3[%c2_16, %c0_17, %c0_18] : memref<9x4x128xbf16, #tpu.memory_space<vmem>>, vector<1x4x128xbf16>
    %29 = vector.shape_cast %28 : vector<1x4x128xbf16> to vector<4x128xbf16>
    %cst_19 = arith.constant dense<0.000000e+00> : vector<256x128xf32>
    %30 = tpu.matmul %27, %29, %cst_19 {dimension_numbers = #tpu.dot_dimension_numbers<[1], [0], [0], [1], [0, 0, 1, 1], [], []>} : vector<256x4xbf16>, vector<4x128xbf16>, vector<256x128xf32> -> vector<256x128xf32>
    %31 = arith.addf %21, %30 : vector<256x128xf32>
    %c1_i32 = arith.constant 1 : i32
    %32 = arith.addi %0, %c1_i32 : i32
    %c0_20 = arith.constant 0 : index
    %33 = arith.index_cast %32 : i32 to index
    %c0_21 = arith.constant 0 : index
    %c0_22 = arith.constant 0 : index
    %34 = vector.load %arg2[%c0_20, %33, %c0_21, %c0_22] : memref<1x18x18x4xf32, #tpu.memory_space<vmem>>, vector<1x16x16x4xf32>
    %35 = vector.shape_cast %34 : vector<1x16x16x4xf32> to vector<16x16x4xf32>
    %36 = vector.shape_cast %35 : vector<16x16x4xf32> to vector<256x4xf32>
    %37 = arith.truncf %36 : vector<256x4xf32> to vector<256x4xbf16>
    %c3 = arith.constant 3 : index
    %c0_23 = arith.constant 0 : index
    %c0_24 = arith.constant 0 : index
    %38 = vector.load %arg3[%c3, %c0_23, %c0_24] : memref<9x4x128xbf16, #tpu.memory_space<vmem>>, vector<1x4x128xbf16>
    %39 = vector.shape_cast %38 : vector<1x4x128xbf16> to vector<4x128xbf16>
    %cst_25 = arith.constant dense<0.000000e+00> : vector<256x128xf32>
    %40 = tpu.matmul %37, %39, %cst_25 {dimension_numbers = #tpu.dot_dimension_numbers<[1], [0], [0], [1], [0, 0, 1, 1], [], []>} : vector<256x4xbf16>, vector<4x128xbf16>, vector<256x128xf32> -> vector<256x128xf32>
    %41 = arith.addf %31, %40 : vector<256x128xf32>
    %c1_i32_26 = arith.constant 1 : i32
    %42 = arith.addi %0, %c1_i32_26 : i32
    %c0_27 = arith.constant 0 : index
    %43 = arith.index_cast %42 : i32 to index
    %c1_28 = arith.constant 1 : index
    %c0_29 = arith.constant 0 : index
    %44 = vector.load %arg2[%c0_27, %43, %c1_28, %c0_29] : memref<1x18x18x4xf32, #tpu.memory_space<vmem>>, vector<1x16x16x4xf32>
    %45 = vector.shape_cast %44 : vector<1x16x16x4xf32> to vector<16x16x4xf32>
    %46 = vector.shape_cast %45 : vector<16x16x4xf32> to vector<256x4xf32>
    %47 = arith.truncf %46 : vector<256x4xf32> to vector<256x4xbf16>
    %c4 = arith.constant 4 : index
    %c0_30 = arith.constant 0 : index
    %c0_31 = arith.constant 0 : index
    %48 = vector.load %arg3[%c4, %c0_30, %c0_31] : memref<9x4x128xbf16, #tpu.memory_space<vmem>>, vector<1x4x128xbf16>
    %49 = vector.shape_cast %48 : vector<1x4x128xbf16> to vector<4x128xbf16>
    %cst_32 = arith.constant dense<0.000000e+00> : vector<256x128xf32>
    %50 = tpu.matmul %47, %49, %cst_32 {dimension_numbers = #tpu.dot_dimension_numbers<[1], [0], [0], [1], [0, 0, 1, 1], [], []>} : vector<256x4xbf16>, vector<4x128xbf16>, vector<256x128xf32> -> vector<256x128xf32>
    %51 = arith.addf %41, %50 : vector<256x128xf32>
    %c1_i32_33 = arith.constant 1 : i32
    %52 = arith.addi %0, %c1_i32_33 : i32
    %c0_34 = arith.constant 0 : index
    %53 = arith.index_cast %52 : i32 to index
    %c2_35 = arith.constant 2 : index
    %c0_36 = arith.constant 0 : index
    %54 = vector.load %arg2[%c0_34, %53, %c2_35, %c0_36] : memref<1x18x18x4xf32, #tpu.memory_space<vmem>>, vector<1x16x16x4xf32>
    %55 = vector.shape_cast %54 : vector<1x16x16x4xf32> to vector<16x16x4xf32>
    %56 = vector.shape_cast %55 : vector<16x16x4xf32> to vector<256x4xf32>
    %57 = arith.truncf %56 : vector<256x4xf32> to vector<256x4xbf16>
    %c5 = arith.constant 5 : index
    %c0_37 = arith.constant 0 : index
    %c0_38 = arith.constant 0 : index
    %58 = vector.load %arg3[%c5, %c0_37, %c0_38] : memref<9x4x128xbf16, #tpu.memory_space<vmem>>, vector<1x4x128xbf16>
    %59 = vector.shape_cast %58 : vector<1x4x128xbf16> to vector<4x128xbf16>
    %cst_39 = arith.constant dense<0.000000e+00> : vector<256x128xf32>
    %60 = tpu.matmul %57, %59, %cst_39 {dimension_numbers = #tpu.dot_dimension_numbers<[1], [0], [0], [1], [0, 0, 1, 1], [], []>} : vector<256x4xbf16>, vector<4x128xbf16>, vector<256x128xf32> -> vector<256x128xf32>
    %61 = arith.addf %51, %60 : vector<256x128xf32>
    %c2_i32 = arith.constant 2 : i32
    %62 = arith.addi %0, %c2_i32 : i32
    %c0_40 = arith.constant 0 : index
    %63 = arith.index_cast %62 : i32 to index
    %c0_41 = arith.constant 0 : index
    %c0_42 = arith.constant 0 : index
    %64 = vector.load %arg2[%c0_40, %63, %c0_41, %c0_42] : memref<1x18x18x4xf32, #tpu.memory_space<vmem>>, vector<1x16x16x4xf32>
    %65 = vector.shape_cast %64 : vector<1x16x16x4xf32> to vector<16x16x4xf32>
    %66 = vector.shape_cast %65 : vector<16x16x4xf32> to vector<256x4xf32>
    %67 = arith.truncf %66 : vector<256x4xf32> to vector<256x4xbf16>
    %c6 = arith.constant 6 : index
    %c0_43 = arith.constant 0 : index
    %c0_44 = arith.constant 0 : index
    %68 = vector.load %arg3[%c6, %c0_43, %c0_44] : memref<9x4x128xbf16, #tpu.memory_space<vmem>>, vector<1x4x128xbf16>
    %69 = vector.shape_cast %68 : vector<1x4x128xbf16> to vector<4x128xbf16>
    %cst_45 = arith.constant dense<0.000000e+00> : vector<256x128xf32>
    %70 = tpu.matmul %67, %69, %cst_45 {dimension_numbers = #tpu.dot_dimension_numbers<[1], [0], [0], [1], [0, 0, 1, 1], [], []>} : vector<256x4xbf16>, vector<4x128xbf16>, vector<256x128xf32> -> vector<256x128xf32>
    %71 = arith.addf %61, %70 : vector<256x128xf32>
    %c2_i32_46 = arith.constant 2 : i32
    %72 = arith.addi %0, %c2_i32_46 : i32
    %c0_47 = arith.constant 0 : index
    %73 = arith.index_cast %72 : i32 to index
    %c1_48 = arith.constant 1 : index
    %c0_49 = arith.constant 0 : index
    %74 = vector.load %arg2[%c0_47, %73, %c1_48, %c0_49] : memref<1x18x18x4xf32, #tpu.memory_space<vmem>>, vector<1x16x16x4xf32>
    %75 = vector.shape_cast %74 : vector<1x16x16x4xf32> to vector<16x16x4xf32>
    %76 = vector.shape_cast %75 : vector<16x16x4xf32> to vector<256x4xf32>
    %77 = arith.truncf %76 : vector<256x4xf32> to vector<256x4xbf16>
    %c7 = arith.constant 7 : index
    %c0_50 = arith.constant 0 : index
    %c0_51 = arith.constant 0 : index
    %78 = vector.load %arg3[%c7, %c0_50, %c0_51] : memref<9x4x128xbf16, #tpu.memory_space<vmem>>, vector<1x4x128xbf16>
    %79 = vector.shape_cast %78 : vector<1x4x128xbf16> to vector<4x128xbf16>
    %cst_52 = arith.constant dense<0.000000e+00> : vector<256x128xf32>
    %80 = tpu.matmul %77, %79, %cst_52 {dimension_numbers = #tpu.dot_dimension_numbers<[1], [0], [0], [1], [0, 0, 1, 1], [], []>} : vector<256x4xbf16>, vector<4x128xbf16>, vector<256x128xf32> -> vector<256x128xf32>
    %81 = arith.addf %71, %80 : vector<256x128xf32>
    %c2_i32_53 = arith.constant 2 : i32
    %82 = arith.addi %0, %c2_i32_53 : i32
    %c0_54 = arith.constant 0 : index
    %83 = arith.index_cast %82 : i32 to index
    %c2_55 = arith.constant 2 : index
    %c0_56 = arith.constant 0 : index
    %84 = vector.load %arg2[%c0_54, %83, %c2_55, %c0_56] : memref<1x18x18x4xf32, #tpu.memory_space<vmem>>, vector<1x16x16x4xf32>
    %85 = vector.shape_cast %84 : vector<1x16x16x4xf32> to vector<16x16x4xf32>
    %86 = vector.shape_cast %85 : vector<16x16x4xf32> to vector<256x4xf32>
    %87 = arith.truncf %86 : vector<256x4xf32> to vector<256x4xbf16>
    %c8 = arith.constant 8 : index
    %c0_57 = arith.constant 0 : index
    %c0_58 = arith.constant 0 : index
    %88 = vector.load %arg3[%c8, %c0_57, %c0_58] : memref<9x4x128xbf16, #tpu.memory_space<vmem>>, vector<1x4x128xbf16>
    %89 = vector.shape_cast %88 : vector<1x4x128xbf16> to vector<4x128xbf16>
    %cst_59 = arith.constant dense<0.000000e+00> : vector<256x128xf32>
    %90 = tpu.matmul %87, %89, %cst_59 {dimension_numbers = #tpu.dot_dimension_numbers<[1], [0], [0], [1], [0, 0, 1, 1], [], []>} : vector<256x4xbf16>, vector<4x128xbf16>, vector<256x128xf32> -> vector<256x128xf32>
    %91 = arith.addf %81, %90 : vector<256x128xf32>
    %c0_60 = arith.constant 0 : index
    %c0_61 = arith.constant 0 : index
    %c0_62 = arith.constant 0 : index
    %92 = vector.load %arg4[%c0_60, %c0_61, %c0_62] : memref<1x256x128xf32, #tpu.memory_space<vmem>>, vector<1x256x128xf32>
    %93 = vector.shape_cast %92 : vector<1x256x128xf32> to vector<256x128xf32>
    %94 = vector.shape_cast %91 : vector<256x128xf32> to vector<1x256x128xf32>
    tpu.vector_store %arg4[%c0_60, %c0_61, %c0_62], %94 {strides = array<i32>} : memref<1x256x128xf32, #tpu.memory_space<vmem>>, vector<1x256x128xf32>,
    %cst_63 = arith.constant dense<0.000000e+00> : vector<128xf32>
    %95 = vector.multi_reduction <add>, %91, %cst_63 [0] : vector<256x128xf32> to vector<128xf32>
    %96 = vector.shape_cast %95 : vector<128xf32> to vector<1x128xf32>
    %c0_64 = arith.constant 0 : index
    %c0_65 = arith.constant 0 : index
    %c0_66 = arith.constant 0 : index
    %c0_67 = arith.constant 0 : index
    %97 = vector.load %arg5[%c0_64, %c0_65, %c0_66, %c0_67] : memref<1x1x2x128xf32, #tpu.memory_space<vmem>>, vector<1x1x1x128xf32>
    %98 = vector.shape_cast %97 : vector<1x1x1x128xf32> to vector<1x128xf32>
    %99 = vector.shape_cast %96 : vector<1x128xf32> to vector<1x1x1x128xf32>
    tpu.vector_store %arg5[%c0_64, %c0_65, %c0_66, %c0_67], %99 {strides = array<i32>} : memref<1x1x2x128xf32, #tpu.memory_space<vmem>>, vector<1x1x1x128xf32>,
    %100 = arith.mulf %91, %91 : vector<256x128xf32>
    %cst_68 = arith.constant dense<0.000000e+00> : vector<128xf32>
    %101 = vector.multi_reduction <add>, %100, %cst_68 [0] : vector<256x128xf32> to vector<128xf32>
    %102 = vector.shape_cast %101 : vector<128xf32> to vector<1x128xf32>
    %c0_69 = arith.constant 0 : index
    %c0_70 = arith.constant 0 : index
    %c1_71 = arith.constant 1 : index
    %c0_72 = arith.constant 0 : index
    %103 = vector.load %arg5[%c0_69, %c0_70, %c1_71, %c0_72] : memref<1x1x2x128xf32, #tpu.memory_space<vmem>>, vector<1x1x1x128xf32>
    %104 = vector.shape_cast %103 : vector<1x1x1x128xf32> to vector<1x128xf32>
    %105 = vector.shape_cast %102 : vector<1x128xf32> to vector<1x1x1x128xf32>
    tpu.vector_store %arg5[%c0_69, %c0_70, %c1_71, %c0_72], %105 {strides = array<i32>} : memref<1x1x2x128xf32, #tpu.memory_space<vmem>>, vector<1x1x1x128xf32>,
    return
  }
  func.func @transform_0(%arg0: i32, %arg1: i32) -> (i32, i32, i32, i32) {
    %c0_i32 = arith.constant 0 : i32
    %c0_i32_0 = arith.constant 0 : i32
    %c0_i32_1 = arith.constant 0 : i32
    %c0_i32_2 = arith.constant 0 : i32
    return %arg0, %c0_i32, %c0_i32_0, %c0_i32_1 : i32, i32, i32, i32
  }
  func.func @transform_1(%arg0: i32, %arg1: i32) -> (i32, i32, i32) {
    %c0_i32 = arith.constant 0 : i32
    %c0_i32_0 = arith.constant 0 : i32
    %c0_i32_1 = arith.constant 0 : i32
    %c0_i32_2 = arith.constant 0 : i32
    return %c0_i32, %c0_i32_0, %c0_i32_1 : i32, i32, i32
  }
  func.func @transform_2(%arg0: i32, %arg1: i32) -> (i32, i32, i32) {
    %c0_i32 = arith.constant 0 : i32
    %c0_i32_0 = arith.constant 0 : i32
    return %arg0, %arg1, %c0_i32 : i32, i32, i32
  }
  func.func @transform_3(%arg0: i32, %arg1: i32) -> (i32, i32, i32, i32) {
    %c0_i32 = arith.constant 0 : i32
    %c0_i32_0 = arith.constant 0 : i32
    %c0_i32_1 = arith.constant 0 : i32
    return %arg0, %arg1, %c0_i32, %c0_i32_0 : i32, i32, i32, i32
  }
}

</mosaic_0001>

<bundles_post_ra>
// kernel: cnn_block.3
= control target key start
LH: loop header
LB: loop body
LE: loop exit
PB: predicated region body
PF: predicated region fallthrough
CT: control target
= control target key end

     0   :  { %s618_s12 = smov 0   ;;  %s620_s13 = smov 0   ;;  %s796_s0 = inlined_call_operand.vmem [shape: f32[2,256,128], index: 0, kind: input, shape index: {}]   ;;  %s797_s1 = inlined_call_operand.vmem [shape: f32[1,128], index: 1, kind: input, shape index: {}]   ;;  %s798_s2 = inlined_call_operand.vmem [shape: f32[1,128], index: 2, kind: input, shape index: {}]   ;;  %s799_s3 = inlined_call_operand.vmem [shape: f32[2,256,128], index: 3, kind: output, shape index: {}]  }
   0x1   :  { %s622_s14 = smov 0  }
   0x2 LB: > { %s25_s15 = sadd.s32 1, %s592_s13  ;;  %p539_p0 = scmp.ge.s32.totalorder %s596_s14, 1  ;;  %s596_s14 = sphi %s622_s14, %s13_s14   ;;  %s592_s13 = sphi %s620_s13, %s801_s13   ;;  %s588_s12 = sphi %s618_s12, %s800_s12  }
   0x3   : > { %p27_p1 = scmp.ge.s32.totalorder %s25_s15, 2  ;;  %p158_p2 = scmp.lt.s32.totalorder %s596_s14, 3 }
   0x5   : > { %s803_s15 = smov (%p27_p1, %s25_s15), 0  ;;  %p159_p3 = pnand %p539_p0, %p158_p2 }
   0x6   : > { %p191_p4 = scmp.lt.s32.totalorder (!%p159_p3), %s588_s12, 1  ;;  %v642_v0 = vld [vmem:[%s797_s1] ss:$0 sm:$0xff] (!%p159_p3) }
   0x7   : > { %162 = sbr.rel (%p159_p3) target bundleno = 63 (0x3f), region = 32  ;;  %v652_v1 = vld [vmem:[%s798_s2] ss:$0 sm:$0xff] (!%p159_p3) }
   0xe   : > { %s805_s12 = smov (!%p191_p4, %s588_s12), 1 }
   0xf   : > { %s548_s16 = sshll.u32 %s805_s12, 8 }
  0x10   : > { %s647_s21 = scalar_lea.vmem %s796_s0, %s548_s16  ;;  %s680_s26 = scalar_lea.vmem %s799_s3, %s548_s16 }
  0x11   : > { %v210_v2 = vld [vmem:[%s647_s21] sm:$0xff]  ;;  %v211_v3 = vld [vmem:[%s647_s21 + $0x8] sm:$0xff]  ;;  %v212_v4 = vld [vmem:[%s647_s21 + $0x10] sm:$0xff] }
  0x12   : > { %v249_v5 = vmul.f32 %v642_v0, %v210_v2  ;;  %v250_v6 = vmul.f32 %v642_v0, %v211_v3  ;;  %v251_v7 = vmul.f32 %v642_v0, %v212_v4  ;;  %v213_v8 = vld [vmem:[%s647_s21 + $0x18] sm:$0xff]  ;;  %v214_v9 = vld [vmem:[%s647_s21 + $0x20] sm:$0xff]  ;;  %v215_v10 = vld [vmem:[%s647_s21 + $0x28] sm:$0xff] }
  0x13   : > { %v252_v11 = vmul.f32 %v642_v0, %v213_v8  ;;  %v253_v12 = vmul.f32 %v642_v0, %v214_v9  ;;  %v254_v13 = vmul.f32 %v642_v0, %v215_v10  ;;  %v216_v14 = vld [vmem:[%s647_s21 + $0x30] sm:$0xff]  ;;  %v217_v15 = vld [vmem:[%s647_s21 + $0x38] sm:$0xff]  ;;  %v218_v24 = vld [vmem:[%s647_s21 + $0x40] sm:$0xff] }
  0x14   : > { %v288_v16 = vadd.f32 %v652_v1, %v249_v5  ;;  %v289_v17 = vadd.f32 %v652_v1, %v250_v6  ;;  %v290_v18 = vadd.f32 %v652_v1, %v251_v7  ;;  %v255_v19 = vmul.f32 %v642_v0, %v216_v14  ;;  %v219_v32 = vld [vmem:[%s647_s21 + $0x48] sm:$0xff]  ;;  %v220_v33 = vld [vmem:[%s647_s21 + $0x50] sm:$0xff]  ;;  %v221_v34 = vld [vmem:[%s647_s21 + $0x58] sm:$0xff] }
  0x15   : > { %v291_v20 = vadd.f32 %v652_v1, %v252_v11  ;;  %v292_v21 = vadd.f32 %v652_v1, %v253_v12  ;;  %v293_v22 = vadd.f32 %v652_v1, %v254_v13  ;;  %v256_v23 = vmul.f32 %v642_v0, %v217_v15  ;;  %v222_v46 = vld [vmem:[%s647_s21 + $0x60] sm:$0xff]  ;;  %v223_v47 = vld [vmem:[%s647_s21 + $0x68] sm:$0xff]  ;;  %v224_v58 = vld [vmem:[%s647_s21 + $0x70] sm:$0xff] }
  0x16   : > { %vm320_vm0 = vcmp.gt.f32.partialorder %v288_v16, 0.0  ;;  %v352_v25 = vmul.f32 0.1, %v288_v16  ;;  %vm321_vm1 = vcmp.gt.f32.partialorder %v289_v17, 0.0  ;;  %v353_v26 = vmul.f32 0.1, %v289_v17 }
  0x17   : > { %vm322_vm2 = vcmp.gt.f32.partialorder %v290_v18, 0.0  ;;  %v354_v27 = vmul.f32 0.1, %v290_v18  ;;  %vm323_vm3 = vcmp.gt.f32.partialorder %v291_v20, 0.0  ;;  %v355_v28 = vmul.f32 0.1, %v291_v20 }
  0x18   : > { %v384_v29 = vsel %vm320_vm0, %v288_v16, %v352_v25  ;;  %v385_v30 = vsel %vm321_vm1, %v289_v17, %v353_v26  ;;  %vm324_vm4 = vcmp.gt.f32.partialorder %v292_v21, 0.0  ;;  %v356_v31 = vmul.f32 0.1, %v292_v21  ;;  %v225_v59 = vld [vmem:[%s647_s21 + $0x78] sm:$0xff]  ;;  %v226_v6 = vld [vmem:[%s647_s21 + $0x80] sm:$0xff]  ;;  %v227_v7 = vld [vmem:[%s647_s21 + $0x88] sm:$0xff] }
  0x19   : > { %416 = vst [vmem:[%s680_s26] sm:$0xff] %v384_v29  ;;  %417 = vst [vmem:[%s680_s26 + $0x8] sm:$0xff] %v385_v30  ;;  %v386_v35 = vsel %vm322_vm2, %v290_v18, %v354_v27  ;;  %v387_v36 = vsel %vm323_vm3, %v291_v20, %v355_v28  ;;  %vm325_vm5 = vcmp.gt.f32.partialorder %v293_v22, 0.0  ;;  %v357_v37 = vmul.f32 0.1, %v293_v22  ;;  %v228_v12 = vld [vmem:[%s647_s21 + $0x90] sm:$0xff]  ;;  %v229_v13 = vld [vmem:[%s647_s21 + $0x98] sm:$0xff] }
  0x1a   : > { %418 = vst [vmem:[%s680_s26 + $0x10] sm:$0xff] %v386_v35  ;;  %419 = vst [vmem:[%s680_s26 + $0x18] sm:$0xff] %v387_v36  ;;  %v388_v38 = vsel %vm324_vm4, %v292_v21, %v356_v31  ;;  %v294_v39 = vadd.f32 %v652_v1, %v255_v19  ;;  %v295_v40 = vadd.f32 %v652_v1, %v256_v23  ;;  %v231_v25 = vld [vmem:[%s647_s21 + $0xa8] sm:$0xff]  ;;  %v232_v36 = vld [vmem:[%s647_s21 + $0xb0] sm:$0xff] }
  0x1b   : > { %v257_v41 = vmul.f32 %v642_v0, %v218_v24  ;;  %420 = vst [vmem:[%s680_s26 + $0x20] sm:$0xff] %v388_v38  ;;  %v389_v42 = vsel %vm325_vm5, %v293_v22, %v357_v37  ;;  %v258_v43 = vmul.f32 %v642_v0, %v219_v32  ;;  %v259_v44 = vmul.f32 %v642_v0, %v220_v33  ;;  %v230_v24 = vld [vmem:[%s647_s21 + $0xa0] sm:$0xff]  ;;  %v233_v37 = vld [vmem:[%s647_s21 + $0xb8] sm:$0xff] }
  0x1c   : > { %v260_v45 = vmul.f32 %v642_v0, %v221_v34  ;;  %421 = vst [vmem:[%s680_s26 + $0x28] sm:$0xff] %v389_v42  ;;  %vm326_vm6 = vcmp.gt.f32.partialorder %v294_v39, 0.0  ;;  %v358_v48 = vmul.f32 0.1, %v294_v39  ;;  %vm327_vm7 = vcmp.gt.f32.partialorder %v295_v40, 0.0 }
  0x1d   : > { %v359_v49 = vmul.f32 0.1, %v295_v40  ;;  %v296_v50 = vadd.f32 %v652_v1, %v257_v41  ;;  %v297_v51 = vadd.f32 %v652_v1, %v258_v43  ;;  %v298_v52 = vadd.f32 %v652_v1, %v259_v44 }
  0x1e   : > { %v299_v53 = vadd.f32 %v652_v1, %v260_v45  ;;  %v390_v54 = vsel %vm326_vm6, %v294_v39, %v358_v48  ;;  %v261_v56 = vmul.f32 %v642_v0, %v222_v46  ;;  %v262_v57 = vmul.f32 %v642_v0, %v223_v47  ;;  %v234_v46 = vld [vmem:[%s647_s21 + $0xc0] sm:$0xff]  ;;  %v235_v47 = vld [vmem:[%s647_s21 + $0xc8] sm:$0xff] }
  0x1f   : > { %v391_v55 = vsel %vm327_vm7, %v295_v40, %v359_v49  ;;  %422 = vst [vmem:[%s680_s26 + $0x30] sm:$0xff] %v390_v54  ;;  %vm328_vm8 = vcmp.gt.f32.partialorder %v296_v50, 0.0  ;;  %v360_v60 = vmul.f32 0.1, %v296_v50  ;;  %vm329_vm9 = vcmp.gt.f32.partialorder %v297_v51, 0.0 }
  0x20   : > { %423 = vst [vmem:[%s680_s26 + $0x38] sm:$0xff] %v391_v55  ;;  %v361_v61 = vmul.f32 0.1, %v297_v51  ;;  %vm330_vm10 = vcmp.gt.f32.partialorder %v298_v52, 0.0  ;;  %v362_v62 = vmul.f32 0.1, %v298_v52  ;;  %v300_v4 = vadd.f32 %v652_v1, %v261_v56 }
  0x21   : > { %vm331_vm11 = vcmp.gt.f32.partialorder %v299_v53, 0.0  ;;  %v363_v63 = vmul.f32 0.1, %v299_v53  ;;  %v392_v2 = vsel %vm328_vm8, %v296_v50, %v360_v60  ;;  %v301_v5 = vadd.f32 %v652_v1, %v262_v57 }
  0x22   : > { %v393_v3 = vsel %vm329_vm9, %v297_v51, %v361_v61  ;;  %424 = vst [vmem:[%s680_s26 + $0x40] sm:$0xff] %v392_v2  ;;  %v394_v8 = vsel %vm330_vm10, %v298_v52, %v362_v62  ;;  %v263_v10 = vmul.f32 %v642_v0, %v224_v58  ;;  %v264_v11 = vmul.f32 %v642_v0, %v225_v59  ;;  %v236_v52 = vld [vmem:[%s647_s21 + $0xd0] sm:$0xff]  ;;  %v238_v2 = vld [vmem:[%s647_s21 + $0xe0] sm:$0xff] }
  0x23   : > { %425 = vst [vmem:[%s680_s26 + $0x48] sm:$0xff] %v393_v3  ;;  %v395_v9 = vsel %vm331_vm11, %v299_v53, %v363_v63  ;;  %426 = vst [vmem:[%s680_s26 + $0x50] sm:$0xff] %v394_v8  ;;  %vm332_vm12 = vcmp.gt.f32.partialorder %v300_v4, 0.0  ;;  %v364_v14 = vmul.f32 0.1, %v300_v4  ;;  %vm333_vm13 = vcmp.gt.f32.partialorder %v301_v5, 0.0 }
  0x24   : > { %427 = vst [vmem:[%s680_s26 + $0x58] sm:$0xff] %v395_v9  ;;  %v365_v15 = vmul.f32 0.1, %v301_v5  ;;  %v302_v16 = vadd.f32 %v652_v1, %v263_v10  ;;  %v303_v17 = vadd.f32 %v652_v1, %v264_v11  ;;  %v265_v18 = vmul.f32 %v642_v0, %v226_v6  ;;  %v237_v53 = vld [vmem:[%s647_s21 + $0xd8] sm:$0xff]  ;;  %v239_v3 = vld [vmem:[%s647_s21 + $0xe8] sm:$0xff] }
  0x25   : > { %v266_v19 = vmul.f32 %v642_v0, %v227_v7  ;;  %v396_v20 = vsel %vm332_vm12, %v300_v4, %v364_v14  ;;  %v267_v22 = vmul.f32 %v642_v0, %v228_v12  ;;  %v268_v23 = vmul.f32 %v642_v0, %v229_v13  ;;  %v240_v14 = vld [vmem:[%s647_s21 + $0xf0] sm:$0xff] }
  0x26   : > { %v397_v21 = vsel %vm333_vm13, %v301_v5, %v365_v15  ;;  %428 = vst [vmem:[%s680_s26 + $0x60] sm:$0xff] %v396_v20  ;;  %vm334_vm14 = vcmp.gt.f32.partialorder %v302_v16, 0.0  ;;  %v366_v26 = vmul.f32 0.1, %v302_v16  ;;  %vm335_vm15 = vcmp.gt.f32.partialorder %v303_v17, 0.0  ;;  %v241_v15 = vld [vmem:[%s647_s21 + $0xf8] sm:$0xff] }
  0x27   : > { %429 = vst [vmem:[%s680_s26 + $0x68] sm:$0xff] %v397_v21  ;;  %v367_v27 = vmul.f32 0.1, %v303_v17  ;;  %v304_v28 = vadd.f32 %v652_v1, %v265_v18  ;;  %v305_v29 = vadd.f32 %v652_v1, %v266_v19  ;;  %v306_v30 = vadd.f32 %v652_v1, %v267_v22 }
  0x28   : > { %v307_v31 = vadd.f32 %v652_v1, %v268_v23  ;;  %v398_v32 = vsel %vm334_vm14, %v302_v16, %v366_v26  ;;  %v269_v34 = vmul.f32 %v642_v0, %v230_v24  ;;  %v270_v35 = vmul.f32 %v642_v0, %v231_v25 }
  0x29   : > { %v399_v33 = vsel %vm335_vm15, %v303_v17, %v367_v27  ;;  %430 = vst [vmem:[%s680_s26 + $0x70] sm:$0xff] %v398_v32  ;;  %vm336_vm0 = vcmp.gt.f32.partialorder %v304_v28, 0.0  ;;  %v368_v38 = vmul.f32 0.1, %v304_v28  ;;  %vm337_vm1 = vcmp.gt.f32.partialorder %v305_v29, 0.0 }
  0x2a   : > { %431 = vst [vmem:[%s680_s26 + $0x78] sm:$0xff] %v399_v33  ;;  %v369_v39 = vmul.f32 0.1, %v305_v29  ;;  %vm338_vm2 = vcmp.gt.f32.partialorder %v306_v30, 0.0  ;;  %v370_v40 = vmul.f32 0.1, %v306_v30  ;;  %v308_v44 = vadd.f32 %v652_v1, %v269_v34 }
  0x2b   : > { %vm339_vm3 = vcmp.gt.f32.partialorder %v307_v31, 0.0  ;;  %v371_v41 = vmul.f32 0.1, %v307_v31  ;;  %v400_v42 = vsel %vm336_vm0, %v304_v28, %v368_v38  ;;  %v309_v45 = vadd.f32 %v652_v1, %v270_v35 }
  0x2c   : > { %v401_v43 = vsel %vm337_vm1, %v305_v29, %v369_v39  ;;  %432 = vst [vmem:[%s680_s26 + $0x80] sm:$0xff] %v400_v42  ;;  %v402_v48 = vsel %vm338_vm2, %v306_v30, %v370_v40  ;;  %v271_v50 = vmul.f32 %v642_v0, %v232_v36  ;;  %v272_v51 = vmul.f32 %v642_v0, %v233_v37 }
  0x2d   : > { %433 = vst [vmem:[%s680_s26 + $0x88] sm:$0xff] %v401_v43  ;;  %v403_v49 = vsel %vm339_vm3, %v307_v31, %v371_v41  ;;  %434 = vst [vmem:[%s680_s26 + $0x90] sm:$0xff] %v402_v48  ;;  %vm340_vm4 = vcmp.gt.f32.partialorder %v308_v44, 0.0  ;;  %v372_v54 = vmul.f32 0.1, %v308_v44  ;;  %vm341_vm5 = vcmp.gt.f32.partialorder %v309_v45, 0.0 }
  0x2e   : > { %435 = vst [vmem:[%s680_s26 + $0x98] sm:$0xff] %v403_v49  ;;  %v373_v55 = vmul.f32 0.1, %v309_v45  ;;  %v310_v56 = vadd.f32 %v652_v1, %v271_v50  ;;  %v311_v57 = vadd.f32 %v652_v1, %v272_v51  ;;  %v273_v58 = vmul.f32 %v642_v0, %v234_v46 }
  0x2f   : > { %v274_v59 = vmul.f32 %v642_v0, %v235_v47  ;;  %v404_v60 = vsel %vm340_vm4, %v308_v44, %v372_v54  ;;  %v275_v62 = vmul.f32 %v642_v0, %v236_v52  ;;  %v276_v63 = vmul.f32 %v642_v0, %v237_v53 }
  0x30   : > { %v405_v61 = vsel %vm341_vm5, %v309_v45, %v373_v55  ;;  %436 = vst [vmem:[%s680_s26 + $0xa0] sm:$0xff] %v404_v60  ;;  %vm342_vm6 = vcmp.gt.f32.partialorder %v310_v56, 0.0  ;;  %v374_v4 = vmul.f32 0.1, %v310_v56  ;;  %vm343_vm7 = vcmp.gt.f32.partialorder %v311_v57, 0.0 }
  0x31   : > { %437 = vst [vmem:[%s680_s26 + $0xa8] sm:$0xff] %v405_v61  ;;  %v375_v5 = vmul.f32 0.1, %v311_v57  ;;  %v312_v6 = vadd.f32 %v652_v1, %v273_v58  ;;  %v313_v7 = vadd.f32 %v652_v1, %v274_v59  ;;  %v314_v8 = vadd.f32 %v652_v1, %v275_v62 }
  0x32   : > { %v315_v9 = vadd.f32 %v652_v1, %v276_v63  ;;  %v406_v10 = vsel %vm342_vm6, %v310_v56, %v374_v4  ;;  %v277_v12 = vmul.f32 %v642_v0, %v238_v2  ;;  %v278_v13 = vmul.f32 %v642_v0, %v239_v3 }
  0x33   : > { %v407_v11 = vsel %vm343_vm7, %v311_v57, %v375_v5  ;;  %438 = vst [vmem:[%s680_s26 + $0xb0] sm:$0xff] %v406_v10  ;;  %vm344_vm8 = vcmp.gt.f32.partialorder %v312_v6, 0.0  ;;  %v376_v16 = vmul.f32 0.1, %v312_v6  ;;  %vm345_vm9 = vcmp.gt.f32.partialorder %v313_v7, 0.0 }
  0x34   : > { %439 = vst [vmem:[%s680_s26 + $0xb8] sm:$0xff] %v407_v11  ;;  %v377_v17 = vmul.f32 0.1, %v313_v7  ;;  %vm346_vm10 = vcmp.gt.f32.partialorder %v314_v8, 0.0  ;;  %v378_v18 = vmul.f32 0.1, %v314_v8  ;;  %v316_v22 = vadd.f32 %v652_v1, %v277_v12 }
  0x35   : > { %vm347_vm11 = vcmp.gt.f32.partialorder %v315_v9, 0.0  ;;  %v379_v19 = vmul.f32 0.1, %v315_v9  ;;  %v408_v20 = vsel %vm344_vm8, %v312_v6, %v376_v16  ;;  %v317_v23 = vadd.f32 %v652_v1, %v278_v13 }
  0x36   : > { %v409_v21 = vsel %vm345_vm9, %v313_v7, %v377_v17  ;;  %440 = vst [vmem:[%s680_s26 + $0xc0] sm:$0xff] %v408_v20  ;;  %v410_v24 = vsel %vm346_vm10, %v314_v8, %v378_v18  ;;  %v279_v26 = vmul.f32 %v642_v0, %v240_v14  ;;  %v280_v27 = vmul.f32 %v642_v0, %v241_v15 }
  0x37   : > { %441 = vst [vmem:[%s680_s26 + $0xc8] sm:$0xff] %v409_v21  ;;  %v411_v25 = vsel %vm347_vm11, %v315_v9, %v379_v19  ;;  %442 = vst [vmem:[%s680_s26 + $0xd0] sm:$0xff] %v410_v24  ;;  %vm348_vm12 = vcmp.gt.f32.partialorder %v316_v22, 0.0  ;;  %v380_v28 = vmul.f32 0.1, %v316_v22  ;;  %vm349_vm13 = vcmp.gt.f32.partialorder %v317_v23, 0.0 }
  0x38   : > { %443 = vst [vmem:[%s680_s26 + $0xd8] sm:$0xff] %v411_v25  ;;  %v381_v29 = vmul.f32 0.1, %v317_v23  ;;  %v318_v30 = vadd.f32 %v652_v1, %v279_v26  ;;  %v319_v31 = vadd.f32 %v652_v1, %v280_v27 }
  0x39   : > { %v412_v32 = vsel %vm348_vm12, %v316_v22, %v380_v28 }
  0x3a   : > { %v413_v33 = vsel %vm349_vm13, %v317_v23, %v381_v29  ;;  %444 = vst [vmem:[%s680_s26 + $0xe0] sm:$0xff] %v412_v32  ;;  %vm350_vm14 = vcmp.gt.f32.partialorder %v318_v30, 0.0  ;;  %v382_v34 = vmul.f32 0.1, %v318_v30  ;;  %vm351_vm15 = vcmp.gt.f32.partialorder %v319_v31, 0.0 }
  0x3b   : > { %445 = vst [vmem:[%s680_s26 + $0xe8] sm:$0xff] %v413_v33  ;;  %v383_v0 = vmul.f32 0.1, %v319_v31 }
  0x3c   : > { %v414_v35 = vsel %vm350_vm14, %v318_v30, %v382_v34 }
  0x3d   : > { %v415_v36 = vsel %vm351_vm15, %v319_v31, %v383_v0  ;;  %446 = vst [vmem:[%s680_s26 + $0xf0] sm:$0xff] %v414_v35 }
  0x3e   : > { %447 = vst [vmem:[%s680_s26 + $0xf8] sm:$0xff] %v415_v36 }
  0x3f PF: > { %s13_s14 = sadd.s32 1, %s596_s14   ;;  %s800_s12 = smov %s592_s13 }
  0x40   : > { %p10_p5 = scmp.ge.s32.totalorder %s13_s14, 4   ;;  %s801_s13 = smov %s803_s15 }
  0x42   :  { %12 = sbr.rel (!%p10_p5) target bundleno = 2 (0x2), region = 62 }

// kernel: cnn_block.2
= control target key start
LH: loop header
LB: loop body
LE: loop exit
PB: predicated region body
PF: predicated region fallthrough
CT: control target
= control target key end

     0   :  { %s4230_s12 = smov 0   ;;  %s4232_s13 = smov 0   ;;  %s4867_s0 = inlined_call_operand.vmem [shape: f32[2,18,18,4], index: 0, kind: input, shape index: {}]   ;;  %s4868_s1 = inlined_call_operand.vmem [shape: bf16[9,4,128], index: 1, kind: input, shape index: {}]   ;;  %s4869_s2 = inlined_call_operand.vmem [shape: f32[2,256,128], index: 2, kind: output, shape index: {0}]   ;;  %s4870_s3 = inlined_call_operand.vmem [shape: f32[2,1,2,128], index: 3, kind: output, shape index: {1}]  }
   0x1   :  { %s4234_s14 = smov 0  }
   0x2 LB: > { %s26_s15 = sadd.s32 1, %s4204_s13  ;;  %p3082_p0 = scmp.ge.s32.totalorder %s4208_s14, 1  ;;  %s4208_s14 = sphi %s4234_s14, %s14_s14   ;;  %s4204_s13 = sphi %s4232_s13, %s4872_s13   ;;  %s4200_s12 = sphi %s4230_s12, %s4871_s12  }
   0x3   : > { %p28_p1 = scmp.ge.s32.totalorder %s26_s15, 2  ;;  %p156_p2 = scmp.lt.s32.totalorder %s4208_s14, 3 }
   0x5   : > { %s4874_s15 = smov (%p28_p1, %s26_s15), 0  ;;  %p157_p3 = pnand %p3082_p0, %p156_p2 }
   0x6   : > { %v3087_v0 = vld [vmem:[%s4868_s1 + $0x2] sm:$0x3] (!%p157_p3)  ;;  %vm365_vm0 = vcmask (!%p157_p3), 1041408   ;;  %v4254_v1 = vld [vmem:[%s4868_s1 + $0x8] sm:$0x3] (!%p157_p3)  ;;  %p191_p4 = scmp.lt.s32.totalorder (!%p157_p3), %s4200_s12, 1 }
   0x7   : > { %160 = sbr.rel (%p157_p3) target bundleno = 541 (0x21d), region = 28  ;;  %4151 = vmatprep.subr.msk.bf16.mxu1 (!%p157_p3), %vm365_vm0, %v3087_v0  ;;  %4155 = vmatprep.subr.msk.bf16.mxu0 (!%p157_p3), %vm365_vm0, %v4254_v1  ;;  %v367_v2 = vsel (!%p157_p3), %vm365_vm0, %v3087_v0, 0  ;;  %v4262_v3 = vsel (!%p157_p3), %vm365_vm0, %v4254_v1, 0  ;;  %v265_v4 = vld [vmem:[%s4868_s1] sm:$0x3] (!%p157_p3)  ;;  %vm316_vm1 = vcmask (!%p157_p3), 31744  }
   0x8   : > { %3588 = vmatpush3.bf16.msra.mxu1 (!%p157_p3), %v367_v2  ;;  %3724 = vmatpush3.bf16.msra.mxu0 (!%p157_p3), %v4262_v3  ;;  %v3267_v5 = vld [vmem:[%s4868_s1 + $0xa] sm:$0x3] (!%p157_p3)  ;;  %v579_v14 = vsel (!%p157_p3), %vm365_vm0, %v265_v4, 0  ;;  %v3316_v20 = vld [vmem:[%s4868_s1 + $0xc] sm:$0x3] (!%p157_p3) }
   0x9   : > { %4152 = vmatprep.subr.msk.bf16.mxu1 (!%p157_p3), %vm365_vm0, %v265_v4  ;;  %4157 = vmatprep.subr.msk.bf16.mxu0 (!%p157_p3), %vm365_vm0, %v3267_v5  ;;  %v1726_v18 = vsel (!%p157_p3), %vm365_vm0, %v3267_v5, 0  ;;  %v4306_v21 = vld [vmem:[%s4868_s1 + $0x4] sm:$0x3] (!%p157_p3)  ;;  %v2023_v52 = vsel (!%p157_p3), %vm365_vm0, %v3316_v20, 0  ;;  %v4385_v53 = vld [vmem:[%s4868_s1 + $0xe] sm:$0x3] (!%p157_p3) }
   0xe   : > { %s4876_s12 = smov (!%p191_p4, %s4200_s12), 1 }
   0xf   : > { %s4161_s24 = smul.u32 432, %s4876_s12  ;;  %s3433_s11 = sshll.u32 %s4876_s12, 8 }
  0x10   : > { %s4815_s18 = scalar_lea.vmem %s4869_s2, %s3433_s11  ;;  %s3086_s19 = sshll.u32 %s4876_s12, 1 }
  0x11   : > { %s4279_s27 = scalar_lea.vmem %s4867_s0, %s4161_s24  ;;  %s212_s22 = scalar_lea.vmem %s4870_s3, %s3086_s19 }
  0x12   : > { %v266_v6 = vld [vmem:[%s4279_s27 + $0x1] sm:$0xff]  ;;  %v267_v7 = vld [vmem:[%s4279_s27 + $0x9] sm:$0xff]  ;;  %v3186_v8 = vld [vmem:[%s4279_s27 + $0x19] sm:$0xff] }
  0x13   : > { %v298_v9 = vpack.c.bf16 %v267_v7, %v266_v6  ;;  %v3187_v10 = vld [vmem:[%s4279_s27 + $0x21] sm:$0xff]  ;;  %v3188_v11 = vld [vmem:[%s4279_s27 + $0x31] sm:$0xff]  ;;  %v3189_v12 = vld [vmem:[%s4279_s27 + $0x39] sm:$0xff] }
  0x14   : > { %v1365_v13 = vpack.c.bf16 %v3187_v10, %v3186_v8  ;;  %v4288_v15 = vpack.c.bf16 %v3189_v12, %v3188_v11  ;;  %v3190_v16 = vld [vmem:[%s4279_s27 + $0x49] sm:$0xff]  ;;  %v3191_v17 = vld [vmem:[%s4279_s27 + $0x51] sm:$0xff]  ;;  %v3192_v22 = vld [vmem:[%s4279_s27 + $0x61] sm:$0xff] }
  0x15   : > { %3589 = vmatprep.mubr.msk.bf16.mxu1 %vm316_vm1, %v298_v9  ;;  %v4294_v19 = vpack.c.bf16 %v3191_v17, %v3190_v16  ;;  %v3193_v23 = vld [vmem:[%s4279_s27 + $0x69] sm:$0xff]  ;;  %v3194_v24 = vld [vmem:[%s4279_s27 + $0x79] sm:$0xff]  ;;  %v3195_v25 = vld [vmem:[%s4279_s27 + $0x81] sm:$0xff] }
  0x16   : > { %3725 = vmatprep.mubr.msk.bf16.mxu0 %vm316_vm1, %v1365_v13  ;;  %3590 = vmatmul.mubr.msk.bf16.vlgmr.msra.gmra.mrb[0].mxu1 %vm316_vm1, %v1365_v13  ;;  %v4319_v26 = vpack.c.bf16 %v3193_v23, %v3192_v22  ;;  %v4321_v27 = vpack.c.bf16 %v3195_v25, %v3194_v24  ;;  %v3196_v28 = vld [vmem:[%s4279_s27 + $0x91] sm:$0xff]  ;;  %v3197_v29 = vld [vmem:[%s4279_s27 + $0x99] sm:$0xff]  ;;  %v3198_v30 = vld [vmem:[%s4279_s27 + $0xa9] sm:$0xff] }
  0x17   : > { %3622 = vmatpush3.bf16.msra.mxu1 %v579_v14  ;;  %3726 = vmatmul.mubr.msk.bf16.vlgmr.msra.gmra.mrb[0].mxu0 %vm316_vm1, %v4288_v15  ;;  %v3199_v31 = vld [vmem:[%s4279_s27 + $0xb1] sm:$0xff]  ;;  %v4335_v32 = vpack.c.bf16 %v3197_v29, %v3196_v28  ;;  %v3200_v34 = vld [vmem:[%s4279_s27 + $0xc1] sm:$0xff]  ;;  %v3201_v35 = vld [vmem:[%s4279_s27 + $0xc9] sm:$0xff] }
  0x18   : > { %3758 = vmatpush3.bf16.msra.mxu0 %v1726_v18  ;;  %3593 = vmatprep.mubr.msk.bf16.mxu1 %vm316_vm1, %v4288_v15  ;;  %v4337_v33 = vpack.c.bf16 %v3199_v31, %v3198_v30  ;;  %v3235_v36 = vld [vmem:[%s4279_s27 + $0x1a] sm:$0xff]  ;;  %v3236_v37 = vld [vmem:[%s4279_s27 + $0x22] sm:$0xff]  ;;  %v4351_v38 = vpack.c.bf16 %v3201_v35, %v3200_v34  ;;  %v3237_v42 = vld [vmem:[%s4279_s27 + $0x32] sm:$0xff] }
  0x19   : > { %3729 = vmatprep.mubr.msk.bf16.mxu0 %vm316_vm1, %v4294_v19  ;;  %4158 = vmatprep.subr.msk.bf16.mxu0 %vm365_vm0, %v3316_v20  ;;  %v4353_v39 = vpack.c.bf16 %v3236_v37, %v3235_v36  ;;  %v284_v40 = vld [vmem:[%s4279_s27 + $0xd9] sm:$0xff]  ;;  %v285_v41 = vld [vmem:[%s4279_s27 + $0xe1] sm:$0xff]  ;;  %v286_v44 = vld [vmem:[%s4279_s27 + $0xf1] sm:$0xff] }
  0x1a   : > { %4153 = vmatprep.subr.msk.bf16.mxu1 %vm365_vm0, %v4306_v21  ;;  %v3238_v43 = vld [vmem:[%s4279_s27 + $0x3a] sm:$0xff]  ;;  %v3239_v46 = vld [vmem:[%s4279_s27 + $0x4a] sm:$0xff]  ;;  %v3240_v47 = vld [vmem:[%s4279_s27 + $0x52] sm:$0xff]  ;;  %v4371_v48 = vpack.c.bf16 %v285_v41, %v284_v40 }
  0x1b   : > { %v287_v45 = vld [vmem:[%s4279_s27 + $0xf9] sm:$0xff]  ;;  %v4373_v49 = vpack.c.bf16 %v3238_v43, %v3237_v42  ;;  %v4377_v51 = vpack.c.bf16 %v3240_v47, %v3239_v46  ;;  %v288_v54 = vld [vmem:[%s4279_s27 + $0x109] sm:$0xff]  ;;  %v289_v55 = vld [vmem:[%s4279_s27 + $0x111] sm:$0xff]  ;;  %v841_v47 = vsel %vm365_vm0, %v4306_v21, 0 }
  0x1c   : > { %v4375_v50 = vpack.c.bf16 %v287_v45, %v286_v44  ;;  %v3241_v56 = vld [vmem:[%s4279_s27 + $0x62] sm:$0xff]  ;;  %v3242_v57 = vld [vmem:[%s4279_s27 + $0x6a] sm:$0xff]  ;;  %v3243_v60 = vld [vmem:[%s4279_s27 + $0x7a] sm:$0xff]  ;;  %v4403_v62 = vpack.c.bf16 %v289_v55, %v288_v54 }
  0x1d   : > { %v290_v58 = vld [vmem:[%s4279_s27 + $0x121] sm:$0xff]  ;;  %v291_v59 = vld [vmem:[%s4279_s27 + $0x129] sm:$0xff]  ;;  %v4405_v63 = vpack.c.bf16 %v3242_v57, %v3241_v56  ;;  %v292_v4 = vld [vmem:[%s4279_s27 + $0x139] sm:$0xff] }
  0x1e   : > { %3594 = vmatmul.mubr.msk.bf16.gmra.mrb[4].mxu1 %vm316_vm1, %v4294_v19  ;;  %v3244_v61 = vld [vmem:[%s4279_s27 + $0x82] sm:$0xff]  ;;  %v4407_v0 = vpack.c.bf16 %v291_v59, %v290_v58  ;;  %v3245_v6 = vld [vmem:[%s4279_s27 + $0x92] sm:$0xff]  ;;  %v3246_v7 = vld [vmem:[%s4279_s27 + $0x9a] sm:$0xff] }
  0x1f   : > { %3730 = vmatmul.mubr.msk.bf16.gmra.mrb[4].mxu0 %vm316_vm1, %v4319_v26  ;;  %3597 = vmatprep.mubr.msk.bf16.mxu1 %vm316_vm1, %v4319_v26  ;;  %v4409_v2 = vpack.c.bf16 %v3244_v61, %v3243_v60  ;;  %v293_v5 = vld [vmem:[%s4279_s27 + $0x141] sm:$0xff]  ;;  %v294_v8 = vld [vmem:[%s4279_s27 + $0x151] sm:$0xff]  ;;  %v295_v9 = vld [vmem:[%s4279_s27 + $0x159] sm:$0xff]  ;;  %v4429_v13 = vpack.c.bf16 %v3246_v7, %v3245_v6 }
  0x20   : > { %3733 = vmatprep.mubr.msk.bf16.mxu0 %vm316_vm1, %v4321_v27  ;;  %v3247_v10 = vld [vmem:[%s4279_s27 + $0xaa] sm:$0xff]  ;;  %v3248_v11 = vld [vmem:[%s4279_s27 + $0xb2] sm:$0xff]  ;;  %v4427_v12 = vpack.c.bf16 %v293_v5, %v292_v4  ;;  %v4431_v14 = vpack.c.bf16 %v295_v9, %v294_v8  ;;  %v3249_v20 = vld [vmem:[%s4279_s27 + $0xc2] sm:$0xff] }
  0x21   : > { %v4433_v16 = vpack.c.bf16 %v3248_v11, %v3247_v10  ;;  %v296_v17 = vld [vmem:[%s4279_s27 + $0x169] sm:$0xff]  ;;  %v297_v18 = vld [vmem:[%s4279_s27 + $0x171] sm:$0xff]  ;;  %v217_v23 = vld [vmem:[%s4279_s27] sm:$0xff] }
  0x22   : > { %v3250_v22 = vld [vmem:[%s4279_s27 + $0xca] sm:$0xff]  ;;  %v3251_v25 = vld [vmem:[%s4279_s27 + $0xda] sm:$0xff]  ;;  %v3252_v28 = vld [vmem:[%s4279_s27 + $0xe2] sm:$0xff]  ;;  %v4451_v29 = vpack.c.bf16 %v297_v18, %v296_v17 }
  0x23   : > { %v218_v24 = vld [vmem:[%s4279_s27 + $0x8] sm:$0xff]  ;;  %v4453_v30 = vpack.c.bf16 %v3250_v22, %v3249_v20  ;;  %v4455_v34 = vpack.c.bf16 %v3252_v28, %v3251_v25  ;;  %v219_v35 = vld [vmem:[%s4279_s27 + $0x18] sm:$0xff]  ;;  %v220_v36 = vld [vmem:[%s4279_s27 + $0x20] sm:$0xff] }
  0x24   : > { %v249_v31 = vpack.c.bf16 %v218_v24, %v217_v23  ;;  %v3253_v37 = vld [vmem:[%s4279_s27 + $0xf2] sm:$0xff]  ;;  %v3254_v40 = vld [vmem:[%s4279_s27 + $0xfa] sm:$0xff]  ;;  %v3255_v43 = vld [vmem:[%s4279_s27 + $0x10a] sm:$0xff]  ;;  %v4472_v45 = vpack.c.bf16 %v220_v36, %v219_v35 }
  0x25   : > { %v221_v41 = vld [vmem:[%s4279_s27 + $0x30] sm:$0xff]  ;;  %v222_v42 = vld [vmem:[%s4279_s27 + $0x38] sm:$0xff]  ;;  %v4474_v46 = vpack.c.bf16 %v3254_v40, %v3253_v37  ;;  %v4487_v55 = vld [vmem:[%s4868_s1 + $0x6] sm:$0x3] }
  0x26   : > { %3598 = vmatmul.mubr.msk.bf16.gmra.mrb[8].mxu1 %vm316_vm1, %v4321_v27  ;;  %v3256_v44 = vld [vmem:[%s4279_s27 + $0x112] sm:$0xff]  ;;  %v223_v56 = vld [vmem:[%s4279_s27 + $0x48] sm:$0xff]  ;;  %v225_v59 = vld [vmem:[%s4279_s27 + $0x60] sm:$0xff] }
  0x27   : > { %3734 = vmatmul.mubr.msk.bf16.gmra.mrb[8].mxu0 %vm316_vm1, %v4335_v32  ;;  %3601 = vmatprep.mubr.msk.bf16.mxu1 %vm316_vm1, %v4335_v32  ;;  %v4480_v54 = vpack.c.bf16 %v3256_v44, %v3255_v43  ;;  %v224_v57 = vld [vmem:[%s4279_s27 + $0x50] sm:$0xff]  ;;  %v3257_v21 = vld [vmem:[%s4279_s27 + $0x122] sm:$0xff]  ;;  %v3259_v61 = vld [vmem:[%s4279_s27 + $0x13a] sm:$0xff] }
  0x28   : > { %3737 = vmatprep.mubr.msk.bf16.mxu0 %vm316_vm1, %v4337_v33  ;;  %v3258_v58 = vld [vmem:[%s4279_s27 + $0x12a] sm:$0xff]  ;;  %v3260_v4 = vld [vmem:[%s4279_s27 + $0x142] sm:$0xff]  ;;  %v4505_v5 = vpack.c.bf16 %v224_v57, %v223_v56  ;;  %v227_v9 = vld [vmem:[%s4279_s27 + $0x78] sm:$0xff] }
  0x29   : > { %v226_v60 = vld [vmem:[%s4279_s27 + $0x68] sm:$0xff]  ;;  %v4507_v6 = vpack.c.bf16 %v3258_v58, %v3257_v21  ;;  %v4511_v8 = vpack.c.bf16 %v3260_v4, %v3259_v61  ;;  %v228_v10 = vld [vmem:[%s4279_s27 + $0x80] sm:$0xff]  ;;  %v3261_v11 = vld [vmem:[%s4279_s27 + $0x152] sm:$0xff]  ;;  %v2317_v61 = vsel %vm365_vm0, %v4385_v53, 0 }
  0x2a   : > { %v4509_v7 = vpack.c.bf16 %v226_v60, %v225_v59  ;;  %v3262_v17 = vld [vmem:[%s4279_s27 + $0x15a] sm:$0xff]  ;;  %v229_v18 = vld [vmem:[%s4279_s27 + $0x90] sm:$0xff]  ;;  %v4529_v24 = vpack.c.bf16 %v228_v10, %v227_v9  ;;  %v231_v35 = vld [vmem:[%s4279_s27 + $0xa8] sm:$0xff] }
  0x2b   : > { %v230_v20 = vld [vmem:[%s4279_s27 + $0x98] sm:$0xff]  ;;  %v3263_v22 = vld [vmem:[%s4279_s27 + $0x16a] sm:$0xff]  ;;  %v4531_v25 = vpack.c.bf16 %v3262_v17, %v3261_v11  ;;  %v3265_v37 = vld [vmem:[%s4279_s27 + $0x182] sm:$0xff] }
  0x2c   : > { %v3264_v23 = vld [vmem:[%s4279_s27 + $0x172] sm:$0xff]  ;;  %v4533_v28 = vpack.c.bf16 %v230_v20, %v229_v18  ;;  %v3266_v40 = vld [vmem:[%s4279_s27 + $0x18a] sm:$0xff]  ;;  %v236_v57 = vld [vmem:[%s4279_s27 + $0xe0] sm:$0xff] }
  0x2d   : > { %v232_v36 = vld [vmem:[%s4279_s27 + $0xb0] sm:$0xff]  ;;  %v4553_v44 = vpack.c.bf16 %v3266_v40, %v3265_v37  ;;  %v235_v56 = vld [vmem:[%s4279_s27 + $0xd8] sm:$0xff]  ;;  %v239_v9 = vld [vmem:[%s4279_s27 + $0x108] sm:$0xff] }
  0x2e   : > { %3602 = vmatmul.mubr.msk.bf16.gmra.mrb[12].mxu1 %vm316_vm1, %v4337_v33  ;;  %v4551_v43 = vpack.c.bf16 %v232_v36, %v231_v35  ;;  %v237_v21 = vld [vmem:[%s4279_s27 + $0xf0] sm:$0xff]  ;;  %v238_v58 = vld [vmem:[%s4279_s27 + $0xf8] sm:$0xff]  ;;  %v4569_v59 = vpack.c.bf16 %v236_v57, %v235_v56  ;;  %v242_v11 = vld [vmem:[%s4279_s27 + $0x128] sm:$0xff] }
  0x2f   : > { %3738 = vmatmul.mubr.msk.bf16.gmra.mrb[12].mxu0 %vm316_vm1, %v4351_v38  ;;  %3605 = vmatprep.mubr.msk.bf16.mxu1 %vm316_vm1, %v4351_v38  ;;  %v4571_v60 = vpack.c.bf16 %v238_v58, %v237_v21  ;;  %v3414_v4 = vld [vmem:[%s4868_s1 + $0x10] sm:$0x3]  ;;  %v243_v20 = vld [vmem:[%s4279_s27 + $0x138] sm:$0xff]  ;;  %v247_v40 = vld [vmem:[%s4279_s27 + $0x168] sm:$0xff]  ;;  %v1138_v58 = vsel %vm365_vm0, %v4487_v55, 0 }
  0x30   : > { %3759 = vmatprep.mubr.msk.bf16.mxu0 %vm316_vm1, %v4353_v39  ;;  %v240_v10 = vld [vmem:[%s4279_s27 + $0x110] sm:$0xff]  ;;  %v246_v35 = vld [vmem:[%s4279_s27 + $0x158] sm:$0xff] }
  0x31   : > { %v4591_v17 = vpack.c.bf16 %v240_v10, %v239_v9  ;;  %v743_v56 = vld [vmem:[%s4279_s27 + $0xa] sm:$0xff]  ;;  %v3315_v9 = vld [vmem:[%s4279_s27 + $0x1a0] sm:$0xff] }
  0x36   : > { %3606 = vmatmul.mubr.msk.bf16.gmra.mrb[16].mxu1 %vm316_vm1, %v4371_v48 }
  0x37   : > { %3760 = vmatmul.mubr.msk.bf16.vlgmr.msra.gmra.mrb[0].mxu0 %vm316_vm1, %v4373_v49  ;;  %3609 = vmatprep.mubr.msk.bf16.mxu1 %vm316_vm1, %v4375_v50 }
  0x38   : > { %3792 = vmatpush3.bf16.msra.mxu0 %v2023_v52  ;;  %3763 = vmatprep.mubr.msk.bf16.mxu0 %vm316_vm1, %v4377_v51  ;;  %v4478_v52 = vpack.c.bf16 %v222_v42, %v221_v41  ;;  %v233_v41 = vld [vmem:[%s4279_s27 + $0xc0] sm:$0xff]  ;;  %v234_v42 = vld [vmem:[%s4279_s27 + $0xc8] sm:$0xff] }
  0x39   : > { %4159 = vmatprep.subr.msk.bf16.mxu0 %vm365_vm0, %v4385_v53  ;;  %v241_v53 = vld [vmem:[%s4279_s27 + $0x120] sm:$0xff] }
  0x3a   : > { %v4593_v18 = vpack.c.bf16 %v242_v11, %v241_v53  ;;  %v2611_v53 = vsel %vm365_vm0, %v3414_v4, 0 }
  0x3e   : > { %3610 = vmatmul.mubr.msk.bf16.gmra.mrb[20].mxu1 %vm316_vm1, %v4403_v62 }
  0x3f   : > { %3764 = vmatmul.mubr.msk.bf16.gmra.mrb[4].mxu0 %vm316_vm1, %v4405_v63  ;;  %3613 = vmatprep.mubr.msk.bf16.mxu1 %vm316_vm1, %v4407_v0 }
  0x40   : > { %3767 = vmatprep.mubr.msk.bf16.mxu0 %vm316_vm1, %v4409_v2 }
  0x46   : > { %3614 = vmatmul.mubr.msk.bf16.gmra.mrb[24].mxu1 %vm316_vm1, %v4427_v12 }
  0x47   : > { %3768 = vmatmul.mubr.msk.bf16.gmra.mrb[8].mxu0 %vm316_vm1, %v4429_v13  ;;  %3617 = vmatprep.mubr.msk.bf16.mxu1 %vm316_vm1, %v4431_v14 }
  0x48   : > { %3771 = vmatprep.mubr.msk.bf16.mxu0 %vm316_vm1, %v4433_v16 }
  0x4e   : > { %3618 = vmatmul.mubr.msk.bf16.gmra.mrb[28].mxu1 %vm316_vm1, %v4451_v29 }
  0x4f   : > { %3772 = vmatmul.mubr.msk.bf16.gmra.mrb[12].mxu0 %vm316_vm1, %v4453_v30  ;;  %3623 = vmatprep.mubr.msk.bf16.mxu1 %vm316_vm1, %v249_v31  ;;  %v4535_v31 = vpack.c.bf16 %v3264_v23, %v3263_v22  ;;  %v244_v22 = vld [vmem:[%s4279_s27 + $0x140] sm:$0xff]  ;;  %v245_v23 = vld [vmem:[%s4279_s27 + $0x150] sm:$0xff] }
  0x50   : > { %3775 = vmatprep.mubr.msk.bf16.mxu0 %vm316_vm1, %v4455_v34  ;;  %v4607_v36 = vpack.c.bf16 %v244_v22, %v243_v20  ;;  %v4609_v37 = vpack.c.bf16 %v246_v35, %v245_v23 }
  0x56   : > { %3624 = vmatmul.mubr.msk.bf16.vlgmr.msra.gmra.mrb[0].mxu1 %vm316_vm1, %v4472_v45 }
  0x57   : > { %3656 = vmatpush3.bf16.msra.mxu1 %v841_v47  ;;  %3776 = vmatmul.mubr.msk.bf16.gmra.mrb[16].mxu0 %vm316_vm1, %v4474_v46  ;;  %v4555_v47 = vpack.c.bf16 %v234_v42, %v233_v41  ;;  %v248_v41 = vld [vmem:[%s4279_s27 + $0x170] sm:$0xff]  ;;  %v742_v42 = vld [vmem:[%s4279_s27 + $0x2] sm:$0xff] }
  0x58   : > { %3627 = vmatprep.mubr.msk.bf16.mxu1 %vm316_vm1, %v4478_v52  ;;  %3779 = vmatprep.mubr.msk.bf16.mxu0 %vm316_vm1, %v4480_v54  ;;  %v4623_v57 = vpack.c.bf16 %v248_v41, %v247_v40  ;;  %v774_v21 = vpack.c.bf16 %v743_v56, %v742_v42 }
  0x59   : > { %4154 = vmatprep.subr.msk.bf16.mxu1 %vm365_vm0, %v4487_v55  ;;  %v3313_v55 = vld [vmem:[%s4279_s27 + $0x188] sm:$0xff] }
  0x5e   : > { %3628 = vmatmul.mubr.msk.bf16.gmra.mrb[4].mxu1 %vm316_vm1, %v4505_v5 }
  0x5f   : > { %3780 = vmatmul.mubr.msk.bf16.gmra.mrb[20].mxu0 %vm316_vm1, %v4507_v6  ;;  %3631 = vmatprep.mubr.msk.bf16.mxu1 %vm316_vm1, %v4509_v7 }
  0x60   : > { %3783 = vmatprep.mubr.msk.bf16.mxu0 %vm316_vm1, %v4511_v8 }
  0x66   : > { %3632 = vmatmul.mubr.msk.bf16.gmra.mrb[8].mxu1 %vm316_vm1, %v4529_v24 }
  0x67   : > { %3784 = vmatmul.mubr.msk.bf16.gmra.mrb[24].mxu0 %vm316_vm1, %v4531_v25  ;;  %3635 = vmatprep.mubr.msk.bf16.mxu1 %vm316_vm1, %v4533_v28 }
  0x68   : > { %3787 = vmatprep.mubr.msk.bf16.mxu0 %vm316_vm1, %v4535_v31 }
  0x6e   : > { %3636 = vmatmul.mubr.msk.bf16.gmra.mrb[12].mxu1 %vm316_vm1, %v4551_v43 }
  0x6f   : > { %3788 = vmatmul.mubr.msk.bf16.gmra.mrb[28].mxu0 %vm316_vm1, %v4553_v44  ;;  %3639 = vmatprep.mubr.msk.bf16.mxu1 %vm316_vm1, %v4555_v47 }
  0x70   : > { %3793 = vmatprep.mubr.msk.bf16.mxu0 %vm316_vm1, %v4478_v52 }
  0x76   : > { %3640 = vmatmul.mubr.msk.bf16.gmra.mrb[16].mxu1 %vm316_vm1, %v4569_v59 }
  0x77   : > { %3794 = vmatmul.mubr.msk.bf16.vlgmr.msra.gmra.mrb[0].mxu0 %vm316_vm1, %v4505_v5  ;;  %3643 = vmatprep.mubr.msk.bf16.mxu1 %vm316_vm1, %v4571_v60 }
  0x78   : > { %3826 = vmatpush3.bf16.msra.mxu0 %v2317_v61  ;;  %3797 = vmatprep.mubr.msk.bf16.mxu0 %vm316_vm1, %v4509_v7 }
  0x79   : > { %4160 = vmatprep.subr.msk.bf16.mxu0 %vm365_vm0, %v3414_v4 }
  0x7e   : > { %3644 = vmatmul.mubr.msk.bf16.gmra.mrb[20].mxu1 %vm316_vm1, %v4591_v17 }
  0x7f   : > { %3798 = vmatmul.mubr.msk.bf16.gmra.mrb[4].mxu0 %vm316_vm1, %v4529_v24  ;;  %3647 = vmatprep.mubr.msk.bf16.mxu1 %vm316_vm1, %v4593_v18 }
  0x80   : > { %3801 = vmatprep.mubr.msk.bf16.mxu0 %vm316_vm1, %v4533_v28 }
  0x86   : > { %3648 = vmatmul.mubr.msk.bf16.gmra.mrb[24].mxu1 %vm316_vm1, %v4607_v36 }
  0x87   : > { %3802 = vmatmul.mubr.msk.bf16.gmra.mrb[8].mxu0 %vm316_vm1, %v4551_v43  ;;  %3651 = vmatprep.mubr.msk.bf16.mxu1 %vm316_vm1, %v4609_v37 }
  0x88   : > { %3805 = vmatprep.mubr.msk.bf16.mxu0 %vm316_vm1, %v4555_v47 }
  0x8e   : > { %3652 = vmatmul.mubr.msk.bf16.gmra.mrb[28].mxu1 %vm316_vm1, %v4623_v57 }
  0x8f   : > { %3806 = vmatmul.mubr.msk.bf16.gmra.mrb[12].mxu0 %vm316_vm1, %v4569_v59  ;;  %3657 = vmatprep.mubr.msk.bf16.mxu1 %vm316_vm1, %v774_v21 }
  0x90   : > { %3809 = vmatprep.mubr.msk.bf16.mxu0 %vm316_vm1, %v4571_v60 }
  0x96   : > { %3658 = vmatmul.mubr.msk.bf16.vlgmr.msra.gmra.mrb[0].mxu1 %vm316_vm1, %v4353_v39  ;;  %v3312_v39 = vld [vmem:[%s4279_s27 + $0x180] sm:$0xff] }
  0x97   : > { %3690 = vmatpush3.bf16.msra.mxu1 %v1138_v58  ;;  %3810 = vmatmul.mubr.msk.bf16.gmra.mrb[16].mxu0 %vm316_vm1, %v4591_v17  ;;  %v4654_v61 = vpack.c.bf16 %v3313_v55, %v3312_v39 }
  0x98   : > { %3661 = vmatprep.mubr.msk.bf16.mxu1 %vm316_vm1, %v4373_v49  ;;  %3813 = vmatprep.mubr.msk.bf16.mxu0 %vm316_vm1, %v4593_v18 }
  0x99   : > { %4156 = vmatprep.subr.msk.bf16.mxu1 %vm365_vm0, %v4254_v1  ;;  %v3314_v1 = vld [vmem:[%s4279_s27 + $0x198] sm:$0xff] }
  0x9a   : > { %v1971_v10 = vpack.c.bf16 %v3315_v9, %v3314_v1 }
  0x9e   : > { %3662 = vmatmul.mubr.msk.bf16.gmra.mrb[4].mxu1 %vm316_vm1, %v4377_v51 }
  0x9f   : > { %3814 = vmatmul.mubr.msk.bf16.gmra.mrb[20].mxu0 %vm316_vm1, %v4607_v36  ;;  %3665 = vmatprep.mubr.msk.bf16.mxu1 %vm316_vm1, %v4405_v63 }
  0xa0   : > { %3817 = vmatprep.mubr.msk.bf16.mxu0 %vm316_vm1, %v4609_v37 }
  0xa6   : > { %3666 = vmatmul.mubr.msk.bf16.gmra.mrb[8].mxu1 %vm316_vm1, %v4409_v2 }
  0xa7   : > { %3818 = vmatmul.mubr.msk.bf16.gmra.mrb[24].mxu0 %vm316_vm1, %v4623_v57  ;;  %3669 = vmatprep.mubr.msk.bf16.mxu1 %vm316_vm1, %v4429_v13 }
  0xa8   : > { %3821 = vmatprep.mubr.msk.bf16.mxu0 %vm316_vm1, %v4654_v61 }
  0xae   : > { %3670 = vmatmul.mubr.msk.bf16.gmra.mrb[12].mxu1 %vm316_vm1, %v4433_v16 }
  0xaf   : > { %3822 = vmatmul.mubr.msk.bf16.gmra.mrb[28].mxu0 %vm316_vm1, %v1971_v10  ;;  %3673 = vmatprep.mubr.msk.bf16.mxu1 %vm316_vm1, %v4453_v30 }
  0xb0   : > { %3827 = vmatprep.mubr.msk.bf16.mxu0 %vm316_vm1, %v4288_v15  ;;  %v3362_v15 = vld [vmem:[%s4279_s27 + $0x189] sm:$0xff] }
  0xb6   : > { %3674 = vmatmul.mubr.msk.bf16.gmra.mrb[16].mxu1 %vm316_vm1, %v4455_v34 }
  0xb7   : > { %3828 = vmatmul.mubr.msk.bf16.vlgmr.msra.gmra.mrb[0].mxu0 %vm316_vm1, %v4294_v19  ;;  %3677 = vmatprep.mubr.msk.bf16.mxu1 %vm316_vm1, %v4474_v46 }
  0xb8   : > { %3860 = vmatpush3.bf16.msra.mxu0 %v2611_v53  ;;  %3831 = vmatprep.mubr.msk.bf16.mxu0 %vm316_vm1, %v4319_v26  ;;  %v3363_v26 = vld [vmem:[%s4279_s27 + $0x199] sm:$0xff] }
  0xbe   : > { %3678 = vmatmul.mubr.msk.bf16.gmra.mrb[20].mxu1 %vm316_vm1, %v4480_v54 }
  0xbf   : > { %3832 = vmatmul.mubr.msk.bf16.gmra.mrb[4].mxu0 %vm316_vm1, %v4321_v27  ;;  %3681 = vmatprep.mubr.msk.bf16.mxu1 %vm316_vm1, %v4507_v6  ;;  %v3364_v27 = vld [vmem:[%s4279_s27 + $0x1a1] sm:$0xff] }
  0xc0   : > { %3835 = vmatprep.mubr.msk.bf16.mxu0 %vm316_vm1, %v4335_v32  ;;  %v2265_v32 = vpack.c.bf16 %v3364_v27, %v3363_v26 }
  0xc6   : > { %3682 = vmatmul.mubr.msk.bf16.gmra.mrb[24].mxu1 %vm316_vm1, %v4511_v8 }
  0xc7   : > { %3836 = vmatmul.mubr.msk.bf16.gmra.mrb[8].mxu0 %vm316_vm1, %v4337_v33  ;;  %3685 = vmatprep.mubr.msk.bf16.mxu1 %vm316_vm1, %v4531_v25  ;;  %v3412_v33 = vld [vmem:[%s4279_s27 + $0x19a] sm:$0xff] }
  0xc8   : > { %3839 = vmatprep.mubr.msk.bf16.mxu0 %vm316_vm1, %v4351_v38  ;;  %v3413_v38 = vld [vmem:[%s4279_s27 + $0x1a2] sm:$0xff] }
  0xce   : > { %3686 = vmatmul.mubr.msk.bf16.gmra.mrb[28].mxu1 %vm316_vm1, %v4535_v31 }
  0xcf   : > { %3840 = vmatmul.mubr.msk.bf16.gmra.mrb[12].mxu0 %vm316_vm1, %v4371_v48  ;;  %3691 = vmatprep.mubr.msk.bf16.mxu1 %vm316_vm1, %v4472_v45 }
  0xd0   : > { %3843 = vmatprep.mubr.msk.bf16.mxu0 %vm316_vm1, %v4375_v50 }
  0xd6   : > { %3692 = vmatmul.mubr.msk.bf16.vlgmr.msra.gmra.mrb[0].mxu1 %vm316_vm1, %v4478_v52 }
  0xd7   : > { %3894 = vmatpush3.bf16.msra.mxu1 %v4262_v3  ;;  %3844 = vmatmul.mubr.msk.bf16.gmra.mrb[16].mxu0 %vm316_vm1, %v4403_v62  ;;  %v3361_v3 = vld [vmem:[%s4279_s27 + $0x181] sm:$0xff] }
  0xd8   : > { %3695 = vmatprep.mubr.msk.bf16.mxu1 %vm316_vm1, %v4505_v5  ;;  %3847 = vmatprep.mubr.msk.bf16.mxu0 %vm316_vm1, %v4407_v0  ;;  %v2264_v19 = vpack.c.bf16 %v3362_v15, %v3361_v3 }
  0xde   : > { %3696 = vmatmul.mubr.msk.bf16.gmra.mrb[4].mxu1 %vm316_vm1, %v4509_v7 }
  0xdf   : > { %3848 = vmatmul.mubr.msk.bf16.gmra.mrb[20].mxu0 %vm316_vm1, %v4427_v12  ;;  %3699 = vmatprep.mubr.msk.bf16.mxu1 %vm316_vm1, %v4529_v24 }
  0xe0   : > { %3851 = vmatprep.mubr.msk.bf16.mxu0 %vm316_vm1, %v4431_v14 }
  0xe6   : > { %3700 = vmatmul.mubr.msk.bf16.gmra.mrb[8].mxu1 %vm316_vm1, %v4533_v28 }
  0xe7   : > { %3852 = vmatmul.mubr.msk.bf16.gmra.mrb[24].mxu0 %vm316_vm1, %v4451_v29  ;;  %3703 = vmatprep.mubr.msk.bf16.mxu1 %vm316_vm1, %v4551_v43 }
  0xe8   : > { %3855 = vmatprep.mubr.msk.bf16.mxu0 %vm316_vm1, %v2264_v19 }
  0xee   : > { %3704 = vmatmul.mubr.msk.bf16.gmra.mrb[12].mxu1 %vm316_vm1, %v4555_v47 }
  0xef   : > { %3856 = vmatmul.mubr.msk.bf16.gmra.mrb[28].mxu0 %vm316_vm1, %v2265_v32  ;;  %3707 = vmatprep.mubr.msk.bf16.mxu1 %vm316_vm1, %v4569_v59 }
  0xf0   : > { %3861 = vmatprep.mubr.msk.bf16.mxu0 %vm316_vm1, %v4373_v49 }
  0xf6   : > { %3708 = vmatmul.mubr.msk.bf16.gmra.mrb[16].mxu1 %vm316_vm1, %v4571_v60 }
  0xf7   : > { %3862 = vmatmul.mubr.msk.bf16.vlgmr.msra.gmra.mrb[0].mxu0 %vm316_vm1, %v4377_v51  ;;  %3711 = vmatprep.mubr.msk.bf16.mxu1 %vm316_vm1, %v4591_v17 }
  0xf8   : > { %3865 = vmatprep.mubr.msk.bf16.mxu0 %vm316_vm1, %v4405_v63 }
  0xfe   : > { %3712 = vmatmul.mubr.msk.bf16.gmra.mrb[20].mxu1 %vm316_vm1, %v4593_v18 }
  0xff   : > { %3866 = vmatmul.mubr.msk.bf16.gmra.mrb[4].mxu0 %vm316_vm1, %v4409_v2  ;;  %3715 = vmatprep.mubr.msk.bf16.mxu1 %vm316_vm1, %v4607_v36 }
 0x100   : > { %3869 = vmatprep.mubr.msk.bf16.mxu0 %vm316_vm1, %v4429_v13 }
 0x106   : > { %3716 = vmatmul.mubr.msk.bf16.gmra.mrb[24].mxu1 %vm316_vm1, %v4609_v37 }
 0x107   : > { %3870 = vmatmul.mubr.msk.bf16.gmra.mrb[8].mxu0 %vm316_vm1, %v4433_v16  ;;  %3719 = vmatprep.mubr.msk.bf16.mxu1 %vm316_vm1, %v4623_v57 }
 0x108   : > { %3873 = vmatprep.mubr.msk.bf16.mxu0 %vm316_vm1, %v4453_v30 }
 0x10e   : > { %3720 = vmatmul.mubr.msk.bf16.gmra.mrb[28].mxu1 %vm316_vm1, %v4654_v61 }
 0x10f   : > { %3874 = vmatmul.mubr.msk.bf16.gmra.mrb[12].mxu0 %vm316_vm1, %v4455_v34  ;;  %3741 = vmatprep.mubr.msk.bf16.mxu1 %vm316_vm1, %v4371_v48  ;;  %v2559_v48 = vpack.c.bf16 %v3413_v38, %v3412_v33 }
 0x110   : > { %3877 = vmatprep.mubr.msk.bf16.mxu0 %vm316_vm1, %v4474_v46 }
 0x116   : > { %3742 = vmatmul.mubr.msk.bf16.vlgmr.msra.gmra.mrb[16].mxu1 %vm316_vm1, %v4375_v50 }
 0x117   : > { %3878 = vmatmul.mubr.msk.bf16.gmra.mrb[16].mxu0 %vm316_vm1, %v4480_v54  ;;  %3745 = vmatprep.mubr.msk.bf16.mxu1 %vm316_vm1, %v4403_v62 }
 0x118   : > { %3881 = vmatprep.mubr.msk.bf16.mxu0 %vm316_vm1, %v4507_v6 }
 0x11e   : > { %3746 = vmatmul.mubr.msk.bf16.gmra.mrb[20].mxu1 %vm316_vm1, %v4407_v0 }
 0x11f   : > { %3882 = vmatmul.mubr.msk.bf16.gmra.mrb[20].mxu0 %vm316_vm1, %v4511_v8  ;;  %3749 = vmatprep.mubr.msk.bf16.mxu1 %vm316_vm1, %v4427_v12 }
 0x120   : > { %3885 = vmatprep.mubr.msk.bf16.mxu0 %vm316_vm1, %v4531_v25 }
 0x126   : > { %3750 = vmatmul.mubr.msk.bf16.gmra.mrb[24].mxu1 %vm316_vm1, %v4431_v14 }
 0x127   : > { %3886 = vmatmul.mubr.msk.bf16.gmra.mrb[24].mxu0 %vm316_vm1, %v4535_v31  ;;  %3753 = vmatprep.mubr.msk.bf16.mxu1 %vm316_vm1, %v4451_v29 }
 0x128   : > { %3889 = vmatprep.mubr.msk.bf16.mxu0 %vm316_vm1, %v4553_v44 }
 0x12e   : > { %3754 = vmatmul.mubr.msk.bf16.gmra.mrb[28].mxu1 %vm316_vm1, %v2264_v19 }
 0x12f   : > { %3890 = vmatmul.mubr.msk.bf16.gmra.mrb[28].mxu0 %vm316_vm1, %v2559_v48 }
 0x1a9   : > { %v3693_v49 = vpop.f32.mrb[0].mxu1 }
 0x1aa   : > { %v1174_v50 = vpop.f32.mrb[1].mxu1 }
 0x1ab   : > { %v3694_v51 = vpop.f32.mrb[2].mxu1 }
 0x1ac   : > { %v1177_v62 = vpop.f32.mrb[3].mxu1 }
 0x1b1   : > { %v3697_v63 = vpop.f32.mrb[4].mxu1 }
 0x1b2   : > { %v1190_v0 = vpop.f32.mrb[5].mxu1 }
 0x1b3   : > { %v3698_v2 = vpop.f32.mrb[6].mxu1 }
 0x1b4   : > { %v1193_v12 = vpop.f32.mrb[7].mxu1 }
 0x1b9   : > { %v3701_v13 = vpop.f32.mrb[8].mxu1 }
 0x1ba   : > { %v1206_v14 = vpop.f32.mrb[9].mxu1 }
 0x1bb   : > { %v3702_v16 = vpop.f32.mrb[10].mxu1 }
 0x1bc   : > { %v4801_v29 = vpop.f32.mrb[11].mxu1 }
 0x1c1   : > { %v4803_v30 = vpop.f32.mrb[12].mxu1 }
 0x1c2   : > { %v4805_v34 = vpop.f32.mrb[13].mxu1 }
 0x1c3   : > { %v4807_v45 = vpop.f32.mrb[14].mxu1 }
 0x1c4   : > { %v4809_v46 = vpop.f32.mrb[15].mxu1 }
 0x1ca   : > { %v3863_v52 = vpop.f32.mrb[0].mxu0 }
 0x1cb   : > { %v3895_v54 = vadd.f32 %v3863_v52, %v3693_v49  ;;  %v2647_v5 = vpop.f32.mrb[1].mxu0 }
 0x1cc   : > { %v3896_v6 = vadd.f32 %v2647_v5, %v1174_v50  ;;  %v3864_v7 = vpop.f32.mrb[2].mxu0 }
 0x1cd   : > { %2808 = vst [vmem:[%s4815_s18 + $0x10] sm:$0xff] %v3895_v54  ;;  %v3897_v8 = vadd.f32 %v3864_v7, %v3694_v51  ;;  %v2650_v24 = vpop.f32.mrb[3].mxu0  ;;  %v2878_v44 = vmul.f32 %v3895_v54, %v3895_v54 }
 0x1ce   : > { %2806 = vst [vmem:[%s4815_s18] sm:$0xff] %v3896_v6  ;;  %v3898_v25 = vadd.f32 %v2650_v24, %v1177_v62  ;;  %v2876_v28 = vmul.f32 %v3896_v6, %v3896_v6 }
 0x1cf   : > { %2809 = vst [vmem:[%s4815_s18 + $0x18] sm:$0xff] %v3897_v8  ;;  %v2879_v17 = vmul.f32 %v3897_v8, %v3897_v8 }
 0x1d0   : > { %2807 = vst [vmem:[%s4815_s18 + $0x8] sm:$0xff] %v3898_v25  ;;  %v2838_v31 = vadd.f32 %v3898_v25, %v3896_v6  ;;  %v2877_v43 = vmul.f32 %v3898_v25, %v3898_v25 }
 0x1d2   : > { %v2839_v47 = vadd.f32 %v3895_v54, %v2838_v31  ;;  %v2908_v59 = vadd.f32 %v2877_v43, %v2876_v28  ;;  %v3867_v60 = vpop.f32.mrb[4].mxu0 }
 0x1d3   : > { %v3899_v4 = vadd.f32 %v3867_v60, %v3697_v63  ;;  %v2663_v11 = vpop.f32.mrb[5].mxu0 }
 0x1d4   : > { %v2909_v18 = vadd.f32 %v2908_v59, %v2878_v44  ;;  %v3900_v20 = vadd.f32 %v2663_v11, %v1190_v0  ;;  %v2840_v22 = vadd.f32 %v3897_v8, %v2839_v47  ;;  %v3868_v23 = vpop.f32.mrb[6].mxu0 }
 0x1d5   : > { %2812 = vst [vmem:[%s4815_s18 + $0x30] sm:$0xff] %v3899_v4  ;;  %v3901_v35 = vadd.f32 %v3868_v23, %v3698_v2  ;;  %v2666_v36 = vpop.f32.mrb[7].mxu0  ;;  %v2882_v58 = vmul.f32 %v3899_v4, %v3899_v4 }
 0x1d6   : > { %2810 = vst [vmem:[%s4815_s18 + $0x20] sm:$0xff] %v3900_v20  ;;  %v2841_v37 = vadd.f32 %v3900_v20, %v2840_v22  ;;  %v2880_v40 = vmul.f32 %v3900_v20, %v3900_v20  ;;  %v2910_v41 = vadd.f32 %v2909_v18, %v2879_v17  ;;  %v3902_v42 = vadd.f32 %v2666_v36, %v1193_v12 }
 0x1d7   : > { %2813 = vst [vmem:[%s4815_s18 + $0x38] sm:$0xff] %v3901_v35  ;;  %v2883_v10 = vmul.f32 %v3901_v35, %v3901_v35 }
 0x1d8   : > { %v2911_v56 = vadd.f32 %v2910_v41, %v2880_v40  ;;  %2811 = vst [vmem:[%s4815_s18 + $0x28] sm:$0xff] %v3902_v42  ;;  %v2842_v57 = vadd.f32 %v3902_v42, %v2841_v37  ;;  %v2881_v21 = vmul.f32 %v3902_v42, %v3902_v42 }
 0x1da   : > { %v2843_v39 = vadd.f32 %v3899_v4, %v2842_v57  ;;  %v2912_v55 = vadd.f32 %v2911_v56, %v2881_v21  ;;  %v3871_v61 = vpop.f32.mrb[8].mxu0 }
 0x1db   : > { %v3903_v1 = vadd.f32 %v3871_v61, %v3701_v13  ;;  %v2679_v9 = vpop.f32.mrb[9].mxu0 }
 0x1dc   : > { %v2913_v53 = vadd.f32 %v2912_v55, %v2882_v58  ;;  %v3904_v3 = vadd.f32 %v2679_v9, %v1206_v14  ;;  %v2844_v15 = vadd.f32 %v3901_v35, %v2843_v39  ;;  %v3872_v19 = vpop.f32.mrb[10].mxu0 }
 0x1dd   : > { %2816 = vst [vmem:[%s4815_s18 + $0x50] sm:$0xff] %v3903_v1  ;;  %v3905_v26 = vadd.f32 %v3872_v19, %v3702_v16  ;;  %v2682_v27 = vpop.f32.mrb[11].mxu0  ;;  %v2886_v62 = vmul.f32 %v3903_v1, %v3903_v1 }
 0x1de   : > { %2814 = vst [vmem:[%s4815_s18 + $0x40] sm:$0xff] %v3904_v3  ;;  %v2845_v32 = vadd.f32 %v3904_v3, %v2844_v15  ;;  %v2884_v33 = vmul.f32 %v3904_v3, %v3904_v3  ;;  %v2914_v38 = vadd.f32 %v2913_v53, %v2883_v10  ;;  %v3906_v48 = vadd.f32 %v2682_v27, %v4801_v29 }
 0x1df   : > { %2817 = vst [vmem:[%s4815_s18 + $0x58] sm:$0xff] %v3905_v26  ;;  %v2887_v14 = vmul.f32 %v3905_v26, %v3905_v26 }
 0x1e0   : > { %v2915_v49 = vadd.f32 %v2914_v38, %v2884_v33  ;;  %2815 = vst [vmem:[%s4815_s18 + $0x48] sm:$0xff] %v3906_v48  ;;  %v2846_v50 = vadd.f32 %v3906_v48, %v2845_v32  ;;  %v2885_v51 = vmul.f32 %v3906_v48, %v3906_v48 }
 0x1e2   : > { %v2847_v63 = vadd.f32 %v3903_v1, %v2846_v50  ;;  %v2916_v0 = vadd.f32 %v2915_v49, %v2885_v51  ;;  %v3875_v2 = vpop.f32.mrb[12].mxu0 }
 0x1e3   : > { %v3907_v12 = vadd.f32 %v3875_v2, %v4803_v30  ;;  %v2695_v13 = vpop.f32.mrb[13].mxu0 }
 0x1e4   : > { %v2917_v16 = vadd.f32 %v2916_v0, %v2886_v62  ;;  %v3908_v29 = vadd.f32 %v2695_v13, %v4805_v34  ;;  %v2848_v52 = vadd.f32 %v3905_v26, %v2847_v63  ;;  %v3876_v54 = vpop.f32.mrb[14].mxu0 }
 0x1e5   : > { %2820 = vst [vmem:[%s4815_s18 + $0x70] sm:$0xff] %v3907_v12  ;;  %v3909_v5 = vadd.f32 %v3876_v54, %v4807_v45  ;;  %v2698_v6 = vpop.f32.mrb[15].mxu0  ;;  %v2890_v34 = vmul.f32 %v3907_v12, %v3907_v12 }
 0x1e6   : > { %2818 = vst [vmem:[%s4815_s18 + $0x60] sm:$0xff] %v3908_v29  ;;  %v2849_v7 = vadd.f32 %v3908_v29, %v2848_v52  ;;  %v2888_v8 = vmul.f32 %v3908_v29, %v3908_v29  ;;  %v2918_v24 = vadd.f32 %v2917_v16, %v2887_v14  ;;  %v3910_v25 = vadd.f32 %v2698_v6, %v4809_v46 }
 0x1e7   : > { %2821 = vst [vmem:[%s4815_s18 + $0x78] sm:$0xff] %v3909_v5  ;;  %v2891_v17 = vmul.f32 %v3909_v5, %v3909_v5 }
 0x1e8   : > { %v2919_v30 = vadd.f32 %v2918_v24, %v2888_v8  ;;  %2819 = vst [vmem:[%s4815_s18 + $0x68] sm:$0xff] %v3910_v25  ;;  %v2850_v28 = vadd.f32 %v3910_v25, %v2849_v7  ;;  %v2889_v31 = vmul.f32 %v3910_v25, %v3910_v25 }
 0x1e9   : > { %v3743_v43 = vpop.f32.mrb[16].mxu1 }
 0x1ea   : > { %v2851_v44 = vadd.f32 %v3907_v12, %v2850_v28  ;;  %v2920_v47 = vadd.f32 %v2919_v30, %v2889_v31  ;;  %v3879_v59 = vpop.f32.mrb[16].mxu0  ;;  %v1532_v45 = vpop.f32.mrb[17].mxu1 }
 0x1eb   : > { %v3911_v60 = vadd.f32 %v3879_v59, %v3743_v43  ;;  %v2711_v4 = vpop.f32.mrb[17].mxu0  ;;  %v3744_v11 = vpop.f32.mrb[18].mxu1 }
 0x1ec   : > { %v2921_v46 = vadd.f32 %v2920_v47, %v2890_v34  ;;  %v3912_v18 = vadd.f32 %v2711_v4, %v1532_v45  ;;  %v2852_v20 = vadd.f32 %v3909_v5, %v2851_v44  ;;  %v3880_v22 = vpop.f32.mrb[18].mxu0  ;;  %v1535_v23 = vpop.f32.mrb[19].mxu1 }
 0x1ed   : > { %2824 = vst [vmem:[%s4815_s18 + $0x90] sm:$0xff] %v3911_v60  ;;  %v3913_v35 = vadd.f32 %v3880_v22, %v3744_v11  ;;  %v2714_v36 = vpop.f32.mrb[19].mxu0  ;;  %v2894_v39 = vmul.f32 %v3911_v60, %v3911_v60 }
 0x1ee   : > { %2822 = vst [vmem:[%s4815_s18 + $0x80] sm:$0xff] %v3912_v18  ;;  %v2853_v37 = vadd.f32 %v3912_v18, %v2852_v20  ;;  %v2892_v40 = vmul.f32 %v3912_v18, %v3912_v18  ;;  %v2922_v41 = vadd.f32 %v2921_v46, %v2891_v17  ;;  %v3914_v42 = vadd.f32 %v2714_v36, %v1535_v23 }
 0x1ef   : > { %2825 = vst [vmem:[%s4815_s18 + $0x98] sm:$0xff] %v3913_v35  ;;  %v2895_v15 = vmul.f32 %v3913_v35, %v3913_v35 }
 0x1f0   : > { %v2923_v56 = vadd.f32 %v2922_v41, %v2892_v40  ;;  %2823 = vst [vmem:[%s4815_s18 + $0x88] sm:$0xff] %v3914_v42  ;;  %v2854_v57 = vadd.f32 %v3914_v42, %v2853_v37  ;;  %v2893_v21 = vmul.f32 %v3914_v42, %v3914_v42 }
 0x1f1   : > { %v3747_v58 = vpop.f32.mrb[20].mxu1 }
 0x1f2   : > { %v2855_v55 = vadd.f32 %v3911_v60, %v2854_v57  ;;  %v2924_v61 = vadd.f32 %v2923_v56, %v2893_v21  ;;  %v3883_v1 = vpop.f32.mrb[20].mxu0  ;;  %v1548_v9 = vpop.f32.mrb[21].mxu1 }
 0x1f3   : > { %v3915_v10 = vadd.f32 %v3883_v1, %v3747_v58  ;;  %v2727_v53 = vpop.f32.mrb[21].mxu0  ;;  %v3748_v3 = vpop.f32.mrb[22].mxu1 }
 0x1f4   : > { %v2925_v19 = vadd.f32 %v2924_v61, %v2894_v39  ;;  %v3916_v26 = vadd.f32 %v2727_v53, %v1548_v9  ;;  %v2856_v27 = vadd.f32 %v3913_v35, %v2855_v55  ;;  %v3884_v32 = vpop.f32.mrb[22].mxu0  ;;  %v1551_v33 = vpop.f32.mrb[23].mxu1 }
 0x1f5   : > { %2828 = vst [vmem:[%s4815_s18 + $0xb0] sm:$0xff] %v3915_v10  ;;  %v3917_v38 = vadd.f32 %v3884_v32, %v3748_v3  ;;  %v2730_v48 = vpop.f32.mrb[23].mxu0  ;;  %v2898_v13 = vmul.f32 %v3915_v10, %v3915_v10 }
 0x1f6   : > { %2826 = vst [vmem:[%s4815_s18 + $0xa0] sm:$0xff] %v3916_v26  ;;  %v2857_v49 = vadd.f32 %v3916_v26, %v2856_v27  ;;  %v2896_v50 = vmul.f32 %v3916_v26, %v3916_v26  ;;  %v2926_v51 = vadd.f32 %v2925_v19, %v2895_v15  ;;  %v3918_v62 = vadd.f32 %v2730_v48, %v1551_v33 }
 0x1f7   : > { %2829 = vst [vmem:[%s4815_s18 + $0xb8] sm:$0xff] %v3917_v38  ;;  %v2899_v7 = vmul.f32 %v3917_v38, %v3917_v38 }
 0x1f8   : > { %v2927_v63 = vadd.f32 %v2926_v51, %v2896_v50  ;;  %2827 = vst [vmem:[%s4815_s18 + $0xa8] sm:$0xff] %v3918_v62  ;;  %v2858_v0 = vadd.f32 %v3918_v62, %v2857_v49  ;;  %v2897_v2 = vmul.f32 %v3918_v62, %v3918_v62 }
 0x1f9   : > { %v3751_v12 = vpop.f32.mrb[24].mxu1 }
 0x1fa   : > { %v2859_v14 = vadd.f32 %v3915_v10, %v2858_v0  ;;  %v2928_v16 = vadd.f32 %v2927_v63, %v2897_v2  ;;  %v3887_v29 = vpop.f32.mrb[24].mxu0  ;;  %v1564_v52 = vpop.f32.mrb[25].mxu1 }
 0x1fb   : > { %v3919_v54 = vadd.f32 %v3887_v29, %v3751_v12  ;;  %v2743_v5 = vpop.f32.mrb[25].mxu0  ;;  %v3752_v6 = vpop.f32.mrb[26].mxu1 }
 0x1fc   : > { %v2929_v8 = vadd.f32 %v2928_v16, %v2898_v13  ;;  %v3920_v24 = vadd.f32 %v2743_v5, %v1564_v52  ;;  %v2860_v25 = vadd.f32 %v3917_v38, %v2859_v14  ;;  %v3888_v30 = vpop.f32.mrb[26].mxu0  ;;  %v1567_v28 = vpop.f32.mrb[27].mxu1 }
 0x1fd   : > { %2832 = vst [vmem:[%s4815_s18 + $0xd0] sm:$0xff] %v3919_v54  ;;  %v3921_v31 = vadd.f32 %v3888_v30, %v3752_v6  ;;  %v2746_v43 = vpop.f32.mrb[27].mxu0  ;;  %v2902_v17 = vmul.f32 %v3919_v54, %v3919_v54 }
 0x1fe   : > { %2830 = vst [vmem:[%s4815_s18 + $0xc0] sm:$0xff] %v3920_v24  ;;  %v2861_v34 = vadd.f32 %v3920_v24, %v2860_v25  ;;  %v2900_v44 = vmul.f32 %v3920_v24, %v3920_v24  ;;  %v2930_v47 = vadd.f32 %v2929_v8, %v2899_v7  ;;  %v3922_v59 = vadd.f32 %v2746_v43, %v1567_v28 }
 0x1ff   : > { %2833 = vst [vmem:[%s4815_s18 + $0xd8] sm:$0xff] %v3921_v31  ;;  %v2903_v37 = vmul.f32 %v3921_v31, %v3921_v31 }
 0x200   : > { %v2931_v45 = vadd.f32 %v2930_v47, %v2900_v44  ;;  %2831 = vst [vmem:[%s4815_s18 + $0xc8] sm:$0xff] %v3922_v59  ;;  %v2862_v60 = vadd.f32 %v3922_v59, %v2861_v34  ;;  %v2901_v4 = vmul.f32 %v3922_v59, %v3922_v59 }
 0x201   : > { %v3755_v11 = vpop.f32.mrb[28].mxu1 }
 0x202   : > { %v2863_v46 = vadd.f32 %v3919_v54, %v2862_v60  ;;  %v2932_v18 = vadd.f32 %v2931_v45, %v2901_v4  ;;  %v3891_v20 = vpop.f32.mrb[28].mxu0  ;;  %v1580_v22 = vpop.f32.mrb[29].mxu1 }
 0x203   : > { %v3923_v23 = vadd.f32 %v3891_v20, %v3755_v11  ;;  %v2759_v35 = vpop.f32.mrb[29].mxu0  ;;  %v3756_v36 = vpop.f32.mrb[30].mxu1 }
 0x204   : > { %v2933_v40 = vadd.f32 %v2932_v18, %v2902_v17  ;;  %v3924_v41 = vadd.f32 %v2759_v35, %v1580_v22  ;;  %v2864_v42 = vadd.f32 %v3921_v31, %v2863_v46  ;;  %v3892_v56 = vpop.f32.mrb[30].mxu0  ;;  %v1583_v57 = vpop.f32.mrb[31].mxu1 }
 0x205   : > { %2836 = vst [vmem:[%s4815_s18 + $0xf0] sm:$0xff] %v3923_v23  ;;  %v3925_v21 = vadd.f32 %v3892_v56, %v3756_v36  ;;  %v2762_v58 = vpop.f32.mrb[31].mxu0  ;;  %v2906_v3 = vmul.f32 %v3923_v23, %v3923_v23 }
 0x206   : > { %2834 = vst [vmem:[%s4815_s18 + $0xe0] sm:$0xff] %v3924_v41  ;;  %v2865_v39 = vadd.f32 %v3924_v41, %v2864_v42  ;;  %v2904_v55 = vmul.f32 %v3924_v41, %v3924_v41  ;;  %v2934_v61 = vadd.f32 %v2933_v40, %v2903_v37  ;;  %v3926_v1 = vadd.f32 %v2762_v58, %v1583_v57 }
 0x207   : > { %2837 = vst [vmem:[%s4815_s18 + $0xf8] sm:$0xff] %v3925_v21  ;;  %v2907_v26 = vmul.f32 %v3925_v21, %v3925_v21 }
 0x208   : > { %v2935_v9 = vadd.f32 %v2934_v61, %v2904_v55  ;;  %2835 = vst [vmem:[%s4815_s18 + $0xe8] sm:$0xff] %v3926_v1  ;;  %v2866_v10 = vadd.f32 %v3926_v1, %v2865_v39  ;;  %v2905_v53 = vmul.f32 %v3926_v1, %v3926_v1 }
 0x20a   : > { %v2867_v15 = vadd.f32 %v3923_v23, %v2866_v10  ;;  %v2936_v19 = vadd.f32 %v2935_v9, %v2905_v53 }
 0x20c   : > { %v2868_v27 = vadd.f32 %v3925_v21, %v2867_v15  ;;  %v2937_v32 = vadd.f32 %v2936_v19, %v2906_v3 }
 0x20e   : > { %v2869_v33 = vrot.slane %v2868_v27, 4  ;;  %v2938_v38 = vadd.f32 %v2937_v32, %v2907_v26 }
 0x210   : > { %v2870_v48 = vadd.f32 %v2869_v33, %v2868_v27  ;;  %v2939_v49 = vrot.slane %v2938_v38, 4 }
 0x212   : > { %v2871_v50 = vrot.slane %v2870_v48, 2  ;;  %v2940_v51 = vadd.f32 %v2939_v49, %v2938_v38 }
 0x214   : > { %v2872_v62 = vadd.f32 %v2871_v50, %v2870_v48  ;;  %v2941_v63 = vrot.slane %v2940_v51, 2 }
 0x216   : > { %v2873_v0 = vrot.slane %v2872_v62, 1  ;;  %v2942_v2 = vadd.f32 %v2941_v63, %v2940_v51 }
 0x218   : > { %v2874_v12 = vadd.f32 %v2873_v0, %v2872_v62  ;;  %v2943_v13 = vrot.slane %v2942_v2, 1 }
 0x21a   : > { %2875 = vst [vmem:[%s212_s22] sm:$0x1] %v2874_v12  ;;  %v2944_v14 = vadd.f32 %v2943_v13, %v2942_v2 }
 0x21c   : > { %2945 = vst [vmem:[%s212_s22 + $0x1] sm:$0x1] %v2944_v14 }
 0x21d PF: > { %s14_s14 = sadd.s32 1, %s4208_s14   ;;  %s4871_s12 = smov %s4204_s13 }
 0x21e   : > { %p11_p5 = scmp.ge.s32.totalorder %s14_s14, 4   ;;  %s4872_s13 = smov %s4874_s15 }
 0x220   :  { %13 = sbr.rel (!%p11_p5) target bundleno = 2 (0x2), region = 81 }

</bundles_post_ra>
